<compile_context>
chip_gen: v6e
topology: v6e:2x2x1
jax: 0.10.0
libtpu: 0.0.40
codegen_flags: <defaults>
</compile_context>

<pallas_src>
import jax
import jax.numpy as jnp
from jax.experimental import pallas as pl
from jax.experimental.pallas import tpu as pltpu

K_IN = 28 * 28          # 784 (full last dim of x -> legal un-padded BlockSpec)
H = 512
N_OUT = 10
N_OUT_PAD = 128         # lane-dense output slab; slice [:, :10] outside


def _round_up(x, m):
    return (x + m - 1) // m * m


def _choose_bt(B, b_tile):
    """Balanced batch tile: minimal padding waste, >=2 grid steps when there is
    enough work (v7x megacore), multiple of 256 once large (full MXU M-pass)."""
    n_steps = max(pl.cdiv(B, b_tile), 1)
    if n_steps < 2 and B > 8:
        n_steps = 2
    bt = _round_up(pl.cdiv(B, n_steps), 8)
    if bt >= 256:
        bt = _round_up(bt, 256)
    return bt


def mlp_kernel(x_ref, w1_ref, b1_ref, w2_ref, b2_ref, w3_ref, b3_ref, o_ref):
    # x tile: (bt, 784) f32 -> bf16 in-kernel; weights bf16; biases f32.
    # All dots accumulate in f32 via preferred_element_type.
    x = x_ref[...].astype(jnp.bfloat16)

    h1 = jnp.dot(x, w1_ref[...], preferred_element_type=jnp.float32)
    h1 = jnp.maximum(h1 + b1_ref[...], 0.0)                       # (bt, 512) f32

    h2 = jnp.dot(h1.astype(jnp.bfloat16), w2_ref[...],
                 preferred_element_type=jnp.float32)
    h2 = jnp.maximum(h2 + b2_ref[...], 0.0)                       # (bt, 512) f32

    logits = jnp.dot(h2.astype(jnp.bfloat16), w3_ref[...],
                     preferred_element_type=jnp.float32)
    o_ref[...] = logits + b3_ref[...]                             # (bt, 128) f32


def mlp_forward(x_nchw, prepped_params, b_tile=1024):
    """x_nchw: (B, 1, 28, 28) float32 (NCHW, like the PyTorch module).
    On v5e you may prefer b_tile=512; defaults target v6e/v7x."""
    w1, b1, w2, b2, w3, b3 = prepped_params
    B = x_nchw.shape[0]

    # nn.Flatten(): keep batch dim, flatten the rest. No cast, no K padding --
    # the kernel reads f32 rows and casts to bf16 itself.
    x = x_nchw.reshape(B, K_IN)                                   # (B, 784) f32

    bt = _choose_bt(B, b_tile)
    Bp = _round_up(B, bt)
    if Bp != B:
        x = jnp.pad(x, ((0, Bp - B), (0, 0)))
    grid = (Bp // bt,)

    # Advisory cost hint (useful FLOPs only).
    flops = 2 * Bp * (K_IN * H + H * H + H * N_OUT)
    bytes_accessed = (Bp * K_IN * 4
                      + (w1.size + w2.size + w3.size) * 2
                      + (b1.size + b2.size + b3.size) * 4
                      + Bp * N_OUT_PAD * 4)

    # VMEM footprint: double-buffered x / out tiles, resident (but still
    # double-reserved) weights/biases, plus in-kernel f32/bf16 temporaries.
    vmem_bytes = (2 * bt * K_IN * 4
                  + 2 * bt * N_OUT_PAD * 4
                  + 2 * (w1.size + w2.size + w3.size) * 2
                  + 2 * (b1.size + b2.size + b3.size) * 4
                  + bt * (K_IN * 2 + 2 * H * 4 + 2 * H * 2))
    vmem_limit = max(int(vmem_bytes * 1.5) + (4 << 20), 32 << 20)
    vmem_limit = min(vmem_limit, 48 << 20)   # stay under v7x 64 MiB/TC physical

    out = pl.pallas_call(
        mlp_kernel,
        out_shape=jax.ShapeDtypeStruct((Bp, N_OUT_PAD), jnp.float32),
        grid=grid,
        in_specs=[
            pl.BlockSpec((bt, K_IN), lambda i: (i, 0)),           # x tile (pipelined)
            pl.BlockSpec((K_IN, H), lambda i: (0, 0)),            # w1 (resident)
            pl.BlockSpec((1, H), lambda i: (0, 0)),               # b1
            pl.BlockSpec((H, H), lambda i: (0, 0)),               # w2
            pl.BlockSpec((1, H), lambda i: (0, 0)),               # b2
            pl.BlockSpec((H, N_OUT_PAD), lambda i: (0, 0)),       # w3 (padded cols)
            pl.BlockSpec((1, N_OUT_PAD), lambda i: (0, 0)),       # b3 (padded cols)
        ],
        out_specs=pl.BlockSpec((bt, N_OUT_PAD), lambda i: (i, 0)),
        compiler_params=pltpu.CompilerParams(
            dimension_semantics=("parallel",),
            vmem_limit_bytes=int(vmem_limit)),
        cost_estimate=pl.CostEstimate(
            flops=int(flops), transcendentals=0,
            bytes_accessed=int(bytes_accessed)),
    )(x, w1, b1, w2, b2, w3, b3)

    return out[:B, :N_OUT]


def init_params(key):
    """PyTorch Linear default init (U[-1/sqrt(fan_in), +1/sqrt(fan_in)]), f32."""
    def linear(key, fan_in, fan_out):
        kw, kb = jax.random.split(key)
        bound = 1.0 / jnp.sqrt(jnp.float32(fan_in))
        # Stored as (in, out): transpose of PyTorch's (out, in) layout.
        w = jax.random.uniform(kw, (fan_in, fan_out), jnp.float32, -bound, bound)
        b = jax.random.uniform(kb, (1, fan_out), jnp.float32, -bound, bound)
        return w, b

    k1, k2, k3 = jax.random.split(key, 3)
    w1, b1 = linear(k1, K_IN, H)
    w2, b2 = linear(k2, H, H)
    w3, b3 = linear(k3, H, N_OUT)
    return (w1, b1, w2, b2, w3, b3)


def prepare_params(params):
    """Offline (constant-folded) conversion to the kernel layout:
    bf16 weights; only the final layer's output columns are padded (10->128)."""
    w1, b1, w2, b2, w3, b3 = params
    w1p = w1.astype(jnp.bfloat16)                                  # (784, 512)
    w2p = w2.astype(jnp.bfloat16)                                  # (512, 512)
    w3p = jnp.zeros((H, N_OUT_PAD), jnp.bfloat16).at[:, :N_OUT].set(
        w3.astype(jnp.bfloat16))
    b3p = jnp.zeros((1, N_OUT_PAD), jnp.float32).at[:, :N_OUT].set(b3)
    return (w1p, b1, w2p, b2, w3p, b3p)


if __name__ == "__main__":
    key = jax.random.PRNGKey(0)
    k_params, k_x = jax.random.split(key)

    params_f32 = init_params(k_params)
    params = prepare_params(params_f32)

    # Small batch, NCHW like the torch tutorial (FashionMNIST images).
    x = jax.random.normal(k_x, (2, 1, 28, 28), jnp.float32)

    out = mlp_forward(x, params)
    out = jax.block_until_ready(out)

    # Reference in plain JAX with the same bf16 rounding of weights/activations
    # (kernel accumulates in f32, so only summation order differs).
    w1, b1, w2, b2, w3, b3 = params_f32
    def q(a):
        return a.astype(jnp.bfloat16).astype(jnp.float32)
    xf = q(x.reshape(x.shape[0], -1))
    h = jnp.maximum(xf @ q(w1) + b1, 0.0)
    h = jnp.maximum(q(h) @ q(w2) + b2, 0.0)
    ref = q(h) @ q(w3) + b3

    assert out.shape == (2, 10)
    assert jnp.allclose(out, ref, atol=1e-2, rtol=1e-2)

    print("KERNEL_OK")
</pallas_src>

<mosaic_0001>
module attributes {stable_mosaic.version = 11 : i64} {
  func.func @mlp_kernel(%arg0: i32, %arg1: memref<8x784xf32, #tpu.memory_space<vmem>>, %arg2: memref<784x512xbf16, #tpu.memory_space<vmem>>, %arg3: memref<1x512xf32, #tpu.memory_space<vmem>>, %arg4: memref<512x512xbf16, #tpu.memory_space<vmem>>, %arg5: memref<1x512xf32, #tpu.memory_space<vmem>>, %arg6: memref<512x128xbf16, #tpu.memory_space<vmem>>, %arg7: memref<1x128xf32, #tpu.memory_space<vmem>>, %arg8: memref<8x128xf32, #tpu.memory_space<vmem>>) attributes {dimension_semantics = [#tpu.dimension_semantics<parallel>], iteration_bounds = array<i64: 1>, scalar_prefetch = 0 : i64, scratch_operands = 0 : i64, tpu.core_type = #tpu.core_type<tc>, window_params = [{transform_indices = @transform_0, window_bounds = array<i64: 8, 784>}, {pipeline_mode = #tpu.pipeline_mode<synchronous>, transform_indices = @transform_1, window_bounds = array<i64: 784, 512>}, {pipeline_mode = #tpu.pipeline_mode<synchronous>, transform_indices = @transform_2, window_bounds = array<i64: 1, 512>}, {pipeline_mode = #tpu.pipeline_mode<synchronous>, transform_indices = @transform_3, window_bounds = array<i64: 512, 512>}, {pipeline_mode = #tpu.pipeline_mode<synchronous>, transform_indices = @transform_4, window_bounds = array<i64: 1, 512>}, {pipeline_mode = #tpu.pipeline_mode<synchronous>, transform_indices = @transform_5, window_bounds = array<i64: 512, 128>}, {pipeline_mode = #tpu.pipeline_mode<synchronous>, transform_indices = @transform_6, window_bounds = array<i64: 1, 128>}, {transform_indices = @transform_7, window_bounds = array<i64: 8, 128>}]} {
    %c0 = arith.constant 0 : index
    %c0_0 = arith.constant 0 : index
    %0 = vector.load %arg1[%c0, %c0_0] : memref<8x784xf32, #tpu.memory_space<vmem>>, vector<8x784xf32>
    %1 = arith.truncf %0 : vector<8x784xf32> to vector<8x784xbf16>
    %c0_1 = arith.constant 0 : index
    %c0_2 = arith.constant 0 : index
    %2 = vector.load %arg2[%c0_1, %c0_2] : memref<784x512xbf16, #tpu.memory_space<vmem>>, vector<784x512xbf16>
    %cst = arith.constant dense<0.000000e+00> : vector<8x512xf32>
    %3 = tpu.matmul %1, %2, %cst {dimension_numbers = #tpu.dot_dimension_numbers<[1], [0], [0], [1], [0, 0, 1, 1], [], []>} : vector<8x784xbf16>, vector<784x512xbf16>, vector<8x512xf32> -> vector<8x512xf32>
    %c0_3 = arith.constant 0 : index
    %c0_4 = arith.constant 0 : index
    %4 = vector.load %arg3[%c0_3, %c0_4] : memref<1x512xf32, #tpu.memory_space<vmem>>, vector<1x512xf32>
    %5 = vector.broadcast %4 : vector<1x512xf32> to vector<8x512xf32>
    %6 = arith.addf %3, %5 : vector<8x512xf32>
    %cst_5 = arith.constant 0.000000e+00 : f32
    %7 = vector.broadcast %cst_5 : f32 to vector<8x512xf32>
    %8 = arith.maximumf %6, %7 : vector<8x512xf32>
    %9 = arith.truncf %8 : vector<8x512xf32> to vector<8x512xbf16>
    %c0_6 = arith.constant 0 : index
    %c0_7 = arith.constant 0 : index
    %10 = vector.load %arg4[%c0_6, %c0_7] : memref<512x512xbf16, #tpu.memory_space<vmem>>, vector<512x512xbf16>
    %cst_8 = arith.constant dense<0.000000e+00> : vector<8x512xf32>
    %11 = tpu.matmul %9, %10, %cst_8 {dimension_numbers = #tpu.dot_dimension_numbers<[1], [0], [0], [1], [0, 0, 1, 1], [], []>} : vector<8x512xbf16>, vector<512x512xbf16>, vector<8x512xf32> -> vector<8x512xf32>
    %c0_9 = arith.constant 0 : index
    %c0_10 = arith.constant 0 : index
    %12 = vector.load %arg5[%c0_9, %c0_10] : memref<1x512xf32, #tpu.memory_space<vmem>>, vector<1x512xf32>
    %13 = vector.broadcast %12 : vector<1x512xf32> to vector<8x512xf32>
    %14 = arith.addf %11, %13 : vector<8x512xf32>
    %cst_11 = arith.constant 0.000000e+00 : f32
    %15 = vector.broadcast %cst_11 : f32 to vector<8x512xf32>
    %16 = arith.maximumf %14, %15 : vector<8x512xf32>
    %17 = arith.truncf %16 : vector<8x512xf32> to vector<8x512xbf16>
    %c0_12 = arith.constant 0 : index
    %c0_13 = arith.constant 0 : index
    %18 = vector.load %arg6[%c0_12, %c0_13] : memref<512x128xbf16, #tpu.memory_space<vmem>>, vector<512x128xbf16>
    %cst_14 = arith.constant dense<0.000000e+00> : vector<8x128xf32>
    %19 = tpu.matmul %17, %18, %cst_14 {dimension_numbers = #tpu.dot_dimension_numbers<[1], [0], [0], [1], [0, 0, 1, 1], [], []>} : vector<8x512xbf16>, vector<512x128xbf16>, vector<8x128xf32> -> vector<8x128xf32>
    %c0_15 = arith.constant 0 : index
    %c0_16 = arith.constant 0 : index
    %20 = vector.load %arg7[%c0_15, %c0_16] : memref<1x128xf32, #tpu.memory_space<vmem>>, vector<1x128xf32>
    %21 = vector.broadcast %20 : vector<1x128xf32> to vector<8x128xf32>
    %22 = arith.addf %19, %21 : vector<8x128xf32>
    %c0_17 = arith.constant 0 : index
    %c0_18 = arith.constant 0 : index
    %23 = vector.load %arg8[%c0_17, %c0_18] : memref<8x128xf32, #tpu.memory_space<vmem>>, vector<8x128xf32>
    tpu.vector_store %arg8[%c0_17, %c0_18], %22 {strides = array<i32>} : memref<8x128xf32, #tpu.memory_space<vmem>>, vector<8x128xf32>,
    return
  }
  func.func @transform_0(%arg0: i32) -> (i32, i32) {
    %c0_i32 = arith.constant 0 : i32
    %c0_i32_0 = arith.constant 0 : i32
    return %arg0, %c0_i32 : i32, i32
  }
  func.func @transform_1(%arg0: i32) -> (i32, i32) {
    %c0_i32 = arith.constant 0 : i32
    %c0_i32_0 = arith.constant 0 : i32
    %c0_i32_1 = arith.constant 0 : i32
    return %c0_i32, %c0_i32_0 : i32, i32
  }
  func.func @transform_2(%arg0: i32) -> (i32, i32) {
    %c0_i32 = arith.constant 0 : i32
    %c0_i32_0 = arith.constant 0 : i32
    %c0_i32_1 = arith.constant 0 : i32
    return %c0_i32, %c0_i32_0 : i32, i32
  }
  func.func @transform_3(%arg0: i32) -> (i32, i32) {
    %c0_i32 = arith.constant 0 : i32
    %c0_i32_0 = arith.constant 0 : i32
    %c0_i32_1 = arith.constant 0 : i32
    return %c0_i32, %c0_i32_0 : i32, i32
  }
  func.func @transform_4(%arg0: i32) -> (i32, i32) {
    %c0_i32 = arith.constant 0 : i32
    %c0_i32_0 = arith.constant 0 : i32
    %c0_i32_1 = arith.constant 0 : i32
    return %c0_i32, %c0_i32_0 : i32, i32
  }
  func.func @transform_5(%arg0: i32) -> (i32, i32) {
    %c0_i32 = arith.constant 0 : i32
    %c0_i32_0 = arith.constant 0 : i32
    %c0_i32_1 = arith.constant 0 : i32
    return %c0_i32, %c0_i32_0 : i32, i32
  }
  func.func @transform_6(%arg0: i32) -> (i32, i32) {
    %c0_i32 = arith.constant 0 : i32
    %c0_i32_0 = arith.constant 0 : i32
    %c0_i32_1 = arith.constant 0 : i32
    return %c0_i32, %c0_i32_0 : i32, i32
  }
  func.func @transform_7(%arg0: i32) -> (i32, i32) {
    %c0_i32 = arith.constant 0 : i32
    %c0_i32_0 = arith.constant 0 : i32
    return %arg0, %c0_i32 : i32, i32
  }
}

</mosaic_0001>

<bundles_post_ra>
// kernel: tpu_custom_call.1
= control target key start
LH: loop header
LB: loop body
LE: loop exit
PB: predicated region body
PF: predicated region fallthrough
CT: control target
= control target key end

     0   :  { %12 = vsyncpa [#allocation3], 0  ;;  %s4176_s0 = inlined_call_operand.hbm [shape: f32[8,784], index: 0, kind: input, shape index: {}]   ;;  %s4177_s1 = inlined_call_operand.hbm [shape: bf16[784,512], index: 1, kind: input, shape index: {}]   ;;  %s4178_s2 = inlined_call_operand.hbm [shape: f32[1,512], index: 2, kind: input, shape index: {}]   ;;  %s4179_s3 = inlined_call_operand.hbm [shape: bf16[512,512], index: 3, kind: input, shape index: {}]   ;;  %s4180_s4 = inlined_call_operand.vmem [shape: f32[1,512], index: 4, kind: input, shape index: {}]   ;;  %s4181_s5 = inlined_call_operand.hbm [shape: bf16[512,128], index: 5, kind: input, shape index: {}]   ;;  %s4182_s6 = inlined_call_operand.vmem [shape: f32[1,128], index: 6, kind: input, shape index: {}]   ;;  %s4183_s7 = inlined_call_operand.hbm [shape: f32[8,128], index: 7, kind: output, shape index: {}]  }
   0x1   :  { %13 = vsyncpa [#allocation6], 0 }
   0x2   :  { %14 = vsyncpa [#allocation9], 0 }
   0x3   :  { %15 = vsyncpa [#allocation4], 0  ;;  %s4027_s24 = smov [#allocation5]  }
   0x4   :  { %s31_s25 = sshll.u32 %s4027_s24, 4  ;;  %s32_s25 = int_to_ptr.vmem [resolvable:$true] %s31_s25 }
   0x5   :  { %s3907_s26 = scalar_lea.vmem %s32_s25, 25088  ;;  %p3912_p1 = scmp.lt.s32.totalorder %s32_s25, %s32_s25 }
   0x6   :  { %p3908_p0 = scmp.ne.s32.totalorder %s32_s25, %s3907_s26  ;;  %p3913_p2 = scmp.lt.s32.totalorder %s3907_s26, %s3907_s26 }
   0x8   :  { %p3914_p3 = por %p3913_p2, %p3912_p1 }
   0xa   :  { %p3915_p4 = pnand %p3914_p3, %p3908_p0 }
   0xc   :  { %3918 = shalt.err (!%p3915_p4)
}
   0xd   :  { %s4028_s27 = smov 256   ;;  %s4029_s28 = smov 16  }
   0xe   :  { %37 = dma.hbm_to_vmem [thread:$0]  %s4177_s1, 25088, %s32_s25, [#allocation6], %s4028_s27, %s4028_s27, %s4029_s28  }
   0xf   :  { %s4030_s8 = smov [#allocation8]   ;;  %s4031_s10 = smov [#allocation2]  }
  0x10   :  { %s53_s9 = sshll.u32 %s4030_s8, 4  ;;  %s22_s11 = sshll.u32 %s4031_s10, 4  ;;  %s54_s9 = int_to_ptr.vmem [resolvable:$true] %s53_s9  ;;  %s23_s11 = int_to_ptr.vmem [resolvable:$true] %s22_s11 }
  0x11   :  { %s3927_s12 = scalar_lea.vmem %s54_s9, 16384  ;;  %p3932_p6 = scmp.lt.s32.totalorder %s54_s9, %s54_s9 }
  0x12   :  { %p3928_p5 = scmp.ne.s32.totalorder %s54_s9, %s3927_s12  ;;  %p3933_p7 = scmp.lt.s32.totalorder %s3927_s12, %s3927_s12 }
  0x14   :  { %p3934_p8 = por %p3933_p7, %p3932_p6 }
  0x16   :  { %p3935_p9 = pnand %p3934_p8, %p3928_p5 }
  0x18   :  { %3938 = shalt.err (!%p3935_p9)
}
  0x19   :  { %59 = dma.hbm_to_vmem [thread:$0]  %s4179_s3, 16384, %s54_s9, [#allocation9], %s4028_s27, %s4028_s27, %s4029_s28  }
  0x1a   :  { %s3947_s15 = scalar_lea.vmem %s23_s11, 896  ;;  %p3952_p11 = scmp.lt.s32.totalorder %s23_s11, %s23_s11 }
  0x1b   :  { %p3948_p10 = scmp.ne.s32.totalorder %s23_s11, %s3947_s15  ;;  %p3953_p12 = scmp.lt.s32.totalorder %s3947_s15, %s3947_s15 }
  0x1d   :  { %p3954_p13 = por %p3953_p12, %p3952_p11 }
  0x1f   :  { %p3955_p0 = pnand %p3954_p13, %p3948_p10 }
  0x21   :  { %3958 = shalt.err (!%p3955_p0)
}
  0x22   :  { %25 = dma.hbm_to_vmem [thread:$0]  %s4176_s0, 896, %s23_s11, [#allocation3]  }
  0x23   :  { %s4032_s17 = smov [#allocation7]   ;;  %s4033_s19 = smov [#allocation10]  }
  0x24   :  { %s44_s18 = sshll.u32 %s4032_s17, 4  ;;  %s67_s20 = sshll.u32 %s4033_s19, 4  ;;  %s45_s18 = int_to_ptr.vmem [resolvable:$true] %s44_s18  ;;  %s68_s20 = int_to_ptr.vmem [resolvable:$true] %s67_s20 }
  0x25   :  { %s3967_s21 = scalar_lea.vmem %s45_s18, 64  ;;  %p3972_p2 = scmp.lt.s32.totalorder %s45_s18, %s45_s18 }
  0x26   :  { %p3968_p1 = scmp.ne.s32.totalorder %s45_s18, %s3967_s21  ;;  %p3973_p3 = scmp.lt.s32.totalorder %s3967_s21, %s3967_s21 }
  0x28   :  { %p3974_p4 = por %p3973_p3, %p3972_p2 }
  0x2a   :  { %p3975_p5 = pnand %p3974_p4, %p3968_p1 }
  0x2c   :  { %3978 = shalt.err (!%p3975_p5)
}
  0x2d   :  { %47 = dma.hbm_to_vmem [thread:$0]  %s4178_s2, 64, %s45_s18, [#allocation6]  }
  0x2e   :  { %s3987_s23 = scalar_lea.vmem %s68_s20, 4096  ;;  %p3992_p7 = scmp.lt.s32.totalorder %s68_s20, %s68_s20 }
  0x2f   :  { %p3988_p6 = scmp.ne.s32.totalorder %s68_s20, %s3987_s23  ;;  %p3993_p8 = scmp.lt.s32.totalorder %s3987_s23, %s3987_s23 }
  0x31   :  { %p3994_p9 = por %p3993_p8, %p3992_p7 }
  0x33   :  { %p3995_p10 = pnand %p3994_p9, %p3988_p6 }
  0x35   :  { %3998 = shalt.err (!%p3995_p10)
}
  0x36   :  { %s4034_s0 = smov 64   ;;  %s4035_s24 = smov 4  }
  0x37   :  { %73 = dma.hbm_to_vmem [thread:$0]  %s4181_s5, 4096, %s68_s20, [#allocation9], %s4034_s0, %s4034_s0, %s4035_s24  }
  0x38   :  { %4019 = dma.done.wait [#allocation3], 896  }
  0x39   :  { %4020 = vsyncadd [#allocation3], 4294966400 }
  0x3a   :  { %4021 = dma.done.wait [#allocation6], 25152  }
  0x3b   :  { %4022 = vsyncadd [#allocation6], 4294942144 }
  0x3c   :  { %4023 = dma.done.wait [#allocation9], 20480  }
  0x3d   :  { %4024 = vsyncadd [#allocation9], 4294946816  ;;  %v3381_v0 = vld [vmem:[#allocation5 + $0xe4] ss:$16 sps:$4 sm:$0xff]   ;;  %v3385_v2 = vld [vmem:[#allocation5 + $0xe0] ss:$16 sps:$4 sm:$0xff]  }
  0x3e   :  { %v3383_v1 = vld [vmem:[#allocation5 + $0x2e4] ss:$16 sps:$4 sm:$0xff]   ;;  %1308 = vmatprep.subr.bf16.mxu0 %v3381_v0  ;;  %v3386_v3 = vld [vmem:[#allocation5 + $0x2e0] ss:$16 sps:$4 sm:$0xff]   ;;  %vm1304_vm0 = vcmask 130048   ;;  %s4037_s28 = smov [#allocation11]  }
  0x3f   :  { %1349 = vmatprep.subr.bf16.mxu1 %v3383_v1  ;;  %v3387_v4 = vld [vmem:[#allocation5 + $0xc4] ss:$16 sps:$4 sm:$0xff]   ;;  %1309 = vmatpush1.bf16.msra.mxu0 %v3385_v2  ;;  %v3391_v6 = vld [vmem:[#allocation5 + $0xc0] ss:$16 sps:$4 sm:$0xff]   ;;  %s2956_s29 = sshll.u32 %s4037_s28, 4  ;;  %s2957_s29 = int_to_ptr.vmem [resolvable:$true] %s2956_s29 }
  0x40   :  { %1350 = vmatpush1.bf16.msra.mxu1 %v3386_v3  ;;  %v3389_v5 = vld [vmem:[#allocation5 + $0x2c4] ss:$16 sps:$4 sm:$0xff]   ;;  %1310 = vmatprep.subr.bf16.mxu0 %v3387_v4  ;;  %v3392_v7 = vld [vmem:[#allocation5 + $0x2c0] ss:$16 sps:$4 sm:$0xff]   ;;  %v92_v4 = vld [vmem:[#allocation2] sm:$0xff]  ;;  %s3999_s30 = scalar_lea.vmem %s2957_s29, 128  ;;  %p4004_p12 = scmp.lt.s32.totalorder %s2957_s29, %s2957_s29 }
  0x41   :  { %1351 = vmatprep.subr.bf16.mxu1 %v3389_v5  ;;  %v3393_v8 = vld [vmem:[#allocation5 + $0xa4] ss:$16 sps:$4 sm:$0xff]   ;;  %v3397_v10 = vld [vmem:[#allocation5 + $0xa0] ss:$16 sps:$4 sm:$0xff]   ;;  %v94_v5 = vld [vmem:[#allocation2 + $0x10] sm:$0xff]  ;;  %p4000_p11 = scmp.ne.s32.totalorder %s2957_s29, %s3999_s30  ;;  %p4005_p13 = scmp.lt.s32.totalorder %s3999_s30, %s3999_s30 }
  0x42   :  { %v3395_v9 = vld [vmem:[#allocation5 + $0x2a4] ss:$16 sps:$4 sm:$0xff]   ;;  %v3398_v11 = vld [vmem:[#allocation5 + $0x2a0] ss:$16 sps:$4 sm:$0xff]  }
  0x43   :  { %1311 = vmatpush1.bf16.msra.mxu0 %v3391_v6  ;;  %v3399_v12 = vld [vmem:[#allocation5 + $0x84] ss:$16 sps:$4 sm:$0xff]   ;;  %v3403_v14 = vld [vmem:[#allocation5 + $0x80] ss:$16 sps:$4 sm:$0xff]   ;;  %p4006_p0 = por %p4005_p13, %p4004_p12 }
  0x44   :  { %1352 = vmatpush1.bf16.msra.mxu1 %v3392_v7  ;;  %1312 = vmatprep.subr.bf16.mxu0 %v3393_v8  ;;  %v3401_v13 = vld [vmem:[#allocation5 + $0x284] ss:$16 sps:$4 sm:$0xff]   ;;  %v3404_v15 = vld [vmem:[#allocation5 + $0x280] ss:$16 sps:$4 sm:$0xff]   ;;  %v4099_v8 = vpack.c.bf16 %v92_v4, %v92_v4  ;;  %v3560_v4 = vld [vmem:[#allocation5 + $0x16c] ss:$16 sps:$4 sm:$0xff]  }
  0x45   :  { %1353 = vmatprep.subr.bf16.mxu1 %v3395_v9  ;;  %v3405_v16 = vld [vmem:[#allocation5 + $0x64] ss:$16 sps:$4 sm:$0xff]   ;;  %v3409_v18 = vld [vmem:[#allocation5 + $0x60] ss:$16 sps:$4 sm:$0xff]   ;;  %v4101_v9 = vpack.c.bf16 %v94_v5, %v94_v5  ;;  %p4007_p1 = pnand %p4006_p0, %p4000_p11 }
  0x46   :  { %v3407_v17 = vld [vmem:[#allocation5 + $0x264] ss:$16 sps:$4 sm:$0xff]   ;;  %v3410_v19 = vld [vmem:[#allocation5 + $0x260] ss:$16 sps:$4 sm:$0xff]  }
  0x47   :  { %1313 = vmatpush1.bf16.msra.mxu0 %v3397_v10  ;;  %v3411_v20 = vld [vmem:[#allocation5 + $0x44] ss:$16 sps:$4 sm:$0xff]   ;;  %v3415_v22 = vld [vmem:[#allocation5 + $0x40] ss:$16 sps:$4 sm:$0xff]  }
  0x48   :  { %1354 = vmatpush1.bf16.msra.mxu1 %v3398_v11  ;;  %1314 = vmatprep.subr.bf16.mxu0 %v3399_v12  ;;  %v3413_v21 = vld [vmem:[#allocation5 + $0x244] ss:$16 sps:$4 sm:$0xff]   ;;  %v3416_v23 = vld [vmem:[#allocation5 + $0x240] ss:$16 sps:$4 sm:$0xff]  }
  0x49   :  { %1355 = vmatprep.subr.bf16.mxu1 %v3401_v13  ;;  %v3417_v24 = vld [vmem:[#allocation5 + $0x24] ss:$16 sps:$4 sm:$0xff]   ;;  %v3421_v26 = vld [vmem:[#allocation5 + $0x20] ss:$16 sps:$4 sm:$0xff]   ;;  %v3488_v13 = vld [vmem:[#allocation5 + $0xec] ss:$16 sps:$4 sm:$0xff]  }
  0x4a   :  { %v3419_v25 = vld [vmem:[#allocation5 + $0x224] ss:$16 sps:$4 sm:$0xff]   ;;  %v3422_v27 = vld [vmem:[#allocation5 + $0x220] ss:$16 sps:$4 sm:$0xff]  }
  0x4b   :  { %1315 = vmatpush1.bf16.msra.mxu0 %v3403_v14  ;;  %v3423_v28 = vld [vmem:[#allocation5 + $0x4] ss:$16 sps:$4 sm:$0xff]   ;;  %v3427_v30 = vld [vmem:[#allocation5] ss:$16 sps:$4 sm:$0xff]  }
  0x4c   :  { %1356 = vmatpush1.bf16.msra.mxu1 %v3404_v15  ;;  %1316 = vmatprep.subr.bf16.mxu0 %v3405_v16  ;;  %v3425_v29 = vld [vmem:[#allocation5 + $0x204] ss:$16 sps:$4 sm:$0xff]   ;;  %v3428_v31 = vld [vmem:[#allocation5 + $0x200] ss:$16 sps:$4 sm:$0xff]   ;;  %v98_v15 = vld [vmem:[#allocation2 + $0x30] sm:$0xff]  ;;  %v4036_v16 = vmov 0  }
  0x4d   :  { %1357 = vmatprep.subr.bf16.mxu1 %v3407_v17  ;;  %v3429_v32 = vld [vmem:[#allocation5 + $0x1e4] ss:$16 sps:$4 sm:$0xff]   ;;  %v3433_v34 = vld [vmem:[#allocation5 + $0x1e0] ss:$16 sps:$4 sm:$0xff]  }
  0x4e   :  { %v3431_v33 = vld [vmem:[#allocation5 + $0x3e4] ss:$16 sps:$4 sm:$0xff]   ;;  %v3434_v35 = vld [vmem:[#allocation5 + $0x3e0] ss:$16 sps:$4 sm:$0xff]  }
  0x4f   :  { %1317 = vmatpush1.bf16.msra.mxu0 %v3409_v18  ;;  %v3435_v36 = vld [vmem:[#allocation5 + $0x1c4] ss:$16 sps:$4 sm:$0xff]   ;;  %v3439_v38 = vld [vmem:[#allocation5 + $0x1c0] ss:$16 sps:$4 sm:$0xff]   ;;  %v3486_v18 = vld [vmem:[#allocation5 + $0xe8] ss:$16 sps:$4 sm:$0xff]  }
  0x50   :  { %1358 = vmatpush1.bf16.msra.mxu1 %v3410_v19  ;;  %1318 = vmatprep.subr.bf16.mxu0 %v3411_v20  ;;  %v3437_v37 = vld [vmem:[#allocation5 + $0x3c4] ss:$16 sps:$4 sm:$0xff]   ;;  %v3440_v39 = vld [vmem:[#allocation5 + $0x3c0] ss:$16 sps:$4 sm:$0xff]   ;;  %v4106_v19 = vpack.c.bf16 %v98_v15, %v98_v15  ;;  %v96_v15 = vld [vmem:[#allocation2 + $0x20] sm:$0xff] }
  0x51   :  { %1359 = vmatprep.subr.bf16.mxu1 %v3413_v21  ;;  %v3441_v40 = vld [vmem:[#allocation5 + $0x1a4] ss:$16 sps:$4 sm:$0xff]   ;;  %v3445_v42 = vld [vmem:[#allocation5 + $0x1a0] ss:$16 sps:$4 sm:$0xff]   ;;  %v3494_v21 = vld [vmem:[#allocation5 + $0xcc] ss:$16 sps:$4 sm:$0xff]  }
  0x52   :  { %v3443_v41 = vld [vmem:[#allocation5 + $0x3a4] ss:$16 sps:$4 sm:$0xff]   ;;  %v3446_v43 = vld [vmem:[#allocation5 + $0x3a0] ss:$16 sps:$4 sm:$0xff]  }
  0x53   :  { %1319 = vmatpush1.bf16.msra.mxu0 %v3415_v22  ;;  %v3447_v44 = vld [vmem:[#allocation5 + $0x184] ss:$16 sps:$4 sm:$0xff]   ;;  %v3451_v47 = vld [vmem:[#allocation5 + $0x180] ss:$16 sps:$4 sm:$0xff]  }
  0x54   :  { %1360 = vmatpush1.bf16.msra.mxu1 %v3416_v23  ;;  %1320 = vmatprep.subr.bf16.mxu0 %v3417_v24  ;;  %v3449_v45 = vld [vmem:[#allocation5 + $0x384] ss:$16 sps:$4 sm:$0xff]   ;;  %v3452_v48 = vld [vmem:[#allocation5 + $0x380] ss:$16 sps:$4 sm:$0xff]   ;;  %v3492_v23 = vld [vmem:[#allocation5 + $0xc8] ss:$16 sps:$4 sm:$0xff]  }
  0x55   :  { %1361 = vmatprep.subr.bf16.mxu1 %v3419_v25  ;;  %v93_v46 = vld [vmem:[#allocation2 + $0x8] sm:$0xff]  ;;  %v95_v50 = vld [vmem:[#allocation2 + $0x18] sm:$0xff]  ;;  %v3500_v25 = vld [vmem:[#allocation5 + $0xac] ss:$16 sps:$4 sm:$0xff]  }
  0x56   :  { %v4093_v49 = vpack.c.bf16 %v93_v46, %v93_v46  ;;  %v3453_v51 = vld [vmem:[#allocation5 + $0x164] ss:$16 sps:$4 sm:$0xff]   ;;  %v4095_v52 = vpack.c.bf16 %v95_v50, %v95_v50  ;;  %v3457_v54 = vld [vmem:[#allocation5 + $0x160] ss:$16 sps:$4 sm:$0xff]  }
  0x57   :  { %1321 = vmatpush1.bf16.msra.mxu0 %v3421_v26  ;;  %v3455_v53 = vld [vmem:[#allocation5 + $0x364] ss:$16 sps:$4 sm:$0xff]   ;;  %v3458_v55 = vld [vmem:[#allocation5 + $0x360] ss:$16 sps:$4 sm:$0xff]  }
  0x58   :  { %1362 = vmatpush1.bf16.msra.mxu1 %v3422_v27  ;;  %1322 = vmatprep.subr.bf16.mxu0 %v3423_v28  ;;  %v3459_v56 = vld [vmem:[#allocation5 + $0x144] ss:$16 sps:$4 sm:$0xff]   ;;  %v3463_v58 = vld [vmem:[#allocation5 + $0x140] ss:$16 sps:$4 sm:$0xff]   ;;  %v3498_v27 = vld [vmem:[#allocation5 + $0xa8] ss:$16 sps:$4 sm:$0xff]  }
  0x59   :  { %1363 = vmatprep.subr.bf16.mxu1 %v3425_v29  ;;  %1340 = vmatprep.mubr.bf16.mxu0 %v4093_v49  ;;  %v3461_v57 = vld [vmem:[#allocation5 + $0x344] ss:$16 sps:$4 sm:$0xff]   ;;  %v3464_v59 = vld [vmem:[#allocation5 + $0x340] ss:$16 sps:$4 sm:$0xff]   ;;  %v3506_v29 = vld [vmem:[#allocation5 + $0x8c] ss:$16 sps:$4 sm:$0xff]  }
  0x5a   :  { %1381 = vmatprep.mubr.bf16.mxu1 %v4095_v52  ;;  %v3465_v60 = vld [vmem:[#allocation5 + $0x124] ss:$16 sps:$4 sm:$0xff]   ;;  %v3469_v62 = vld [vmem:[#allocation5 + $0x120] ss:$16 sps:$4 sm:$0xff]  }
  0x5b   :  { %1323 = vmatpush1.bf16.msra.mxu0 %v3427_v30  ;;  %v3467_v61 = vld [vmem:[#allocation5 + $0x324] ss:$16 sps:$4 sm:$0xff]   ;;  %v3470_v63 = vld [vmem:[#allocation5 + $0x320] ss:$16 sps:$4 sm:$0xff]  }
  0x5c   :  { %1364 = vmatpush1.bf16.msra.mxu1 %v3428_v31  ;;  %1324 = vmatprep.subr.bf16.mxu0 %v3429_v32  ;;  %v3471_v0 = vld [vmem:[#allocation5 + $0x104] ss:$16 sps:$4 sm:$0xff]   ;;  %v3475_v2 = vld [vmem:[#allocation5 + $0x100] ss:$16 sps:$4 sm:$0xff]   ;;  %v3504_v31 = vld [vmem:[#allocation5 + $0x88] ss:$16 sps:$4 sm:$0xff]  }
  0x5d   :  { %1365 = vmatprep.subr.bf16.mxu1 %v3431_v33  ;;  %v3473_v1 = vld [vmem:[#allocation5 + $0x304] ss:$16 sps:$4 sm:$0xff]   ;;  %v3476_v3 = vld [vmem:[#allocation5 + $0x300] ss:$16 sps:$4 sm:$0xff]   ;;  %v3512_v33 = vld [vmem:[#allocation5 + $0x6c] ss:$16 sps:$4 sm:$0xff]  }
  0x5e   :  { %v3479_v6 = vld [vmem:[#allocation5 + $0x4e4] ss:$16 sps:$4 sm:$0xff]   ;;  %v3477_v10 = vld [vmem:[#allocation5 + $0x4e0] ss:$16 sps:$4 sm:$0xff]  }
  0x5f   :  { %1325 = vmatpush2.bf16.msra.mxu0 %v3433_v34  ;;  %v3482_v7 = vld [vmem:[#allocation5 + $0x604] ss:$16 sps:$4 sm:$0xff]   ;;  %v3480_v11 = vld [vmem:[#allocation5 + $0x600] ss:$16 sps:$4 sm:$0xff]  }
  0x60   :  { %1366 = vmatpush2.bf16.msra.mxu1 %v3434_v35  ;;  %1326 = vmatprep.subr.bf16.mxu0 %v3435_v36  ;;  %v3485_v12 = vld [vmem:[#allocation5 + $0x4c4] ss:$16 sps:$4 sm:$0xff]   ;;  %v3483_v14 = vld [vmem:[#allocation5 + $0x4c0] ss:$16 sps:$4 sm:$0xff]  }
  0x61   :  { %1367 = vmatprep.subr.bf16.mxu1 %v3437_v37  ;;  %v3491_v17 = vld [vmem:[#allocation5 + $0x4a4] ss:$16 sps:$4 sm:$0xff]   ;;  %v3489_v20 = vld [vmem:[#allocation5 + $0x4a0] ss:$16 sps:$4 sm:$0xff]   ;;  %v3510_v37 = vld [vmem:[#allocation5 + $0x68] ss:$16 sps:$4 sm:$0xff]  }
  0x62   :  { %v3497_v22 = vld [vmem:[#allocation5 + $0x484] ss:$16 sps:$4 sm:$0xff]   ;;  %v3495_v24 = vld [vmem:[#allocation5 + $0x480] ss:$16 sps:$4 sm:$0xff]  }
  0x63   :  { %1327 = vmatpush2.bf16.msra.mxu0 %v3439_v38  ;;  %v3503_v26 = vld [vmem:[#allocation5 + $0x464] ss:$16 sps:$4 sm:$0xff]   ;;  %v3501_v28 = vld [vmem:[#allocation5 + $0x460] ss:$16 sps:$4 sm:$0xff]  }
  0x64   :  { %1368 = vmatpush2.bf16.msra.mxu1 %v3440_v39  ;;  %1328 = vmatprep.subr.bf16.mxu0 %v3441_v40  ;;  %v3509_v30 = vld [vmem:[#allocation5 + $0x444] ss:$16 sps:$4 sm:$0xff]   ;;  %v3507_v32 = vld [vmem:[#allocation5 + $0x440] ss:$16 sps:$4 sm:$0xff]   ;;  %v3518_v39 = vld [vmem:[#allocation5 + $0x4c] ss:$16 sps:$4 sm:$0xff]  }
  0x65   :  { %1369 = vmatprep.subr.bf16.mxu1 %v3443_v41  ;;  %v3515_v34 = vld [vmem:[#allocation5 + $0x424] ss:$16 sps:$4 sm:$0xff]   ;;  %v3513_v38 = vld [vmem:[#allocation5 + $0x420] ss:$16 sps:$4 sm:$0xff]   ;;  %v3516_v41 = vld [vmem:[#allocation5 + $0x48] ss:$16 sps:$4 sm:$0xff]  }
  0x66   :  { %v97_v35 = vld [vmem:[#allocation2 + $0x28] sm:$0xff] }
  0x67   :  { %1329 = vmatpush2.bf16.msra.mxu0 %v3445_v42  ;;  %v4111_v36 = vpack.c.bf16 %v97_v35, %v97_v35  ;;  %v3521_v40 = vld [vmem:[#allocation5 + $0x404] ss:$16 sps:$4 sm:$0xff]   ;;  %v3519_v42 = vld [vmem:[#allocation5 + $0x400] ss:$16 sps:$4 sm:$0xff]   ;;  %v3599_v35 = vld [vmem:[#allocation5 + $0x26c] ss:$16 sps:$4 sm:$0xff]  }
  0x68   :  { %1370 = vmatpush2.bf16.msra.mxu1 %v3446_v43  ;;  %1330 = vmatprep.subr.bf16.mxu0 %v3447_v44  ;;  %v3524_v43 = vld [vmem:[#allocation5 + $0x2c] ss:$16 sps:$4 sm:$0xff]   ;;  %v3527_v44 = vld [vmem:[#allocation5 + $0x5e4] ss:$16 sps:$4 sm:$0xff]   ;;  %v3525_v46 = vld [vmem:[#allocation5 + $0x5e0] ss:$16 sps:$4 sm:$0xff]  }
  0x69   :  { %1371 = vmatprep.subr.bf16.mxu1 %v3449_v45  ;;  %v3522_v45 = vld [vmem:[#allocation5 + $0x28] ss:$16 sps:$4 sm:$0xff]   ;;  %v3531_v50 = vld [vmem:[#allocation5 + $0x5c0] ss:$16 sps:$4 sm:$0xff]   ;;  %v3563_v5 = vld [vmem:[#allocation5 + $0x524] ss:$16 sps:$4 sm:$0xff]  }
  0x6b   :  { %1331 = vmatpush2.bf16.msra.mxu0 %v3451_v47  ;;  %v3530_v47 = vld [vmem:[#allocation5 + $0xc] ss:$16 sps:$4 sm:$0xff]  }
  0x6c   :  { %1372 = vmatpush2.bf16.msra.mxu1 %v3452_v48  ;;  %1332 = vmatprep.subr.bf16.mxu0 %v3453_v51  ;;  %v3533_v48 = vld [vmem:[#allocation5 + $0x5c4] ss:$16 sps:$4 sm:$0xff]   ;;  %v3536_v51 = vld [vmem:[#allocation5 + $0x1ec] ss:$16 sps:$4 sm:$0xff]  }
  0x6d   :  { %1373 = vmatprep.subr.bf16.mxu1 %v3455_v53  ;;  %v3539_v53 = vld [vmem:[#allocation5 + $0x5a4] ss:$16 sps:$4 sm:$0xff]  }
  0x6f   :  { %1333 = vmatpush2.bf16.msra.mxu0 %v3457_v54  ;;  %v3534_v54 = vld [vmem:[#allocation5 + $0x1e8] ss:$16 sps:$4 sm:$0xff]  }
  0x70   :  { %1374 = vmatpush2.bf16.msra.mxu1 %v3458_v55  ;;  %1334 = vmatprep.subr.bf16.mxu0 %v3459_v56  ;;  %v3537_v55 = vld [vmem:[#allocation5 + $0x5a0] ss:$16 sps:$4 sm:$0xff]   ;;  %v3542_v56 = vld [vmem:[#allocation5 + $0x1cc] ss:$16 sps:$4 sm:$0xff]  }
  0x71   :  { %1375 = vmatprep.subr.bf16.mxu1 %v3461_v57  ;;  %v3545_v57 = vld [vmem:[#allocation5 + $0x584] ss:$16 sps:$4 sm:$0xff]  }
  0x73   :  { %1335 = vmatpush2.bf16.msra.mxu0 %v3463_v58  ;;  %v3540_v58 = vld [vmem:[#allocation5 + $0x1c8] ss:$16 sps:$4 sm:$0xff]  }
  0x74   :  { %1376 = vmatpush2.bf16.msra.mxu1 %v3464_v59  ;;  %1336 = vmatprep.subr.bf16.mxu0 %v3465_v60  ;;  %v3543_v59 = vld [vmem:[#allocation5 + $0x580] ss:$16 sps:$4 sm:$0xff]   ;;  %v3548_v60 = vld [vmem:[#allocation5 + $0x1ac] ss:$16 sps:$4 sm:$0xff]  }
  0x75   :  { %1377 = vmatprep.subr.bf16.mxu1 %v3467_v61  ;;  %v3551_v61 = vld [vmem:[#allocation5 + $0x564] ss:$16 sps:$4 sm:$0xff]  }
  0x77   :  { %1337 = vmatpush2.bf16.msra.mxu0 %v3469_v62  ;;  %v3546_v62 = vld [vmem:[#allocation5 + $0x1a8] ss:$16 sps:$4 sm:$0xff]  }
  0x78   :  { %1378 = vmatpush2.bf16.msra.mxu1 %v3470_v63  ;;  %1338 = vmatprep.subr.bf16.mxu0 %v3471_v0  ;;  %v3549_v63 = vld [vmem:[#allocation5 + $0x560] ss:$16 sps:$4 sm:$0xff]   ;;  %v3554_v0 = vld [vmem:[#allocation5 + $0x18c] ss:$16 sps:$4 sm:$0xff]  }
  0x79   :  { %1379 = vmatprep.subr.bf16.mxu1 %v3473_v1  ;;  %v3557_v1 = vld [vmem:[#allocation5 + $0x544] ss:$16 sps:$4 sm:$0xff]  }
  0x7b   :  { %1339 = vmatpush2.bf16.msra.mxu0 %v3475_v2  ;;  %v3552_v2 = vld [vmem:[#allocation5 + $0x188] ss:$16 sps:$4 sm:$0xff]  }
  0x7c   :  { %1380 = vmatpush2.bf16.msra.mxu1 %v3476_v3  ;;  %1390 = vmatprep.subr.bf16.mxu0 %v3479_v6  ;;  %v3555_v3 = vld [vmem:[#allocation5 + $0x540] ss:$16 sps:$4 sm:$0xff]   ;;  %v3558_v6 = vld [vmem:[#allocation5 + $0x168] ss:$16 sps:$4 sm:$0xff]  }
  0x7d   :  { %1445 = vmatprep.subr.bf16.mxu1 %v3482_v7  ;;  %v3561_v7 = vld [vmem:[#allocation5 + $0x520] ss:$16 sps:$4 sm:$0xff]  }
  0x7e   :  { %1341 = vmatmul.mubr.bf16.vlgmr.msra.gmra.mxu0 %v4099_v8 }
  0x7f   :  { %1382 = vmatmul.mubr.bf16.vlgmr.msra.gmra.mxu1 %v4101_v9  ;;  %1391 = vmatpush1.bf16.msra.mxu0 %v3477_v10  ;;  %v3566_v10 = vld [vmem:[#allocation5 + $0x14c] ss:$16 sps:$4 sm:$0xff]  }
  0x80   :  { %1446 = vmatpush1.bf16.msra.mxu1 %v3480_v11  ;;  %1392 = vmatprep.subr.bf16.mxu0 %v3485_v12  ;;  %v3569_v11 = vld [vmem:[#allocation5 + $0x504] ss:$16 sps:$4 sm:$0xff]   ;;  %v3564_v12 = vld [vmem:[#allocation5 + $0x148] ss:$16 sps:$4 sm:$0xff]  }
  0x81   :  { %1463 = vmatprep.mubr.bf16.mxu1 %v4036_v16  ;;  %1472 = vmatprep.subr.bf16.mxu1 %v3488_v13  ;;  %v3567_v13 = vld [vmem:[#allocation5 + $0x500] ss:$16 sps:$4 sm:$0xff]  }
  0x82   :  { %1422 = vmatprep.mubr.bf16.mxu0 %v4111_v36 }
  0x83   :  { %1393 = vmatpush1.bf16.msra.mxu0 %v3483_v14  ;;  %v3572_v14 = vld [vmem:[#allocation5 + $0x12c] ss:$16 sps:$4 sm:$0xff]  }
  0x84   :  { %1394 = vmatprep.subr.bf16.mxu0 %v3491_v17  ;;  %v3575_v17 = vld [vmem:[#allocation5 + $0x2ec] ss:$16 sps:$4 sm:$0xff]  }
  0x87   :  { %3163 = vmatmul.mubr.msk.bf16.vlgmr.msra.gmra.mxu1 %vm1304_vm0, %v4106_v19  ;;  %1395 = vmatpush1.bf16.msra.mxu0 %v3489_v20  ;;  %v4114_v20 = vpack.c.bf16 %v96_v15, %v96_v15  ;;  %v3662_v15 = vld [vmem:[#allocation5 + $0x54c] ss:$16 sps:$4 sm:$0xff]  }
  0x88   :  { %1473 = vmatpush1.bf16.msra.mxu1 %v3486_v18  ;;  %1396 = vmatprep.subr.bf16.mxu0 %v3497_v22  ;;  %v3570_v18 = vld [vmem:[#allocation5 + $0x128] ss:$16 sps:$4 sm:$0xff]   ;;  %v3578_v22 = vld [vmem:[#allocation5 + $0x10c] ss:$16 sps:$4 sm:$0xff]  }
  0x89   :  { %1474 = vmatprep.subr.bf16.mxu1 %v3494_v21  ;;  %1504 = vmatprep.mubr.bf16.mxu1 %v4093_v49  ;;  %v3528_v49 = vld [vmem:[#allocation5 + $0x8] ss:$16 sps:$4 sm:$0xff]  }
  0x8a   :  { %v3573_v21 = vld [vmem:[#allocation5 + $0x2e8] ss:$16 sps:$4 sm:$0xff]  }
  0x8b   :  { %1397 = vmatpush1.bf16.msra.mxu0 %v3495_v24  ;;  %v3576_v24 = vld [vmem:[#allocation5 + $0x108] ss:$16 sps:$4 sm:$0xff]  }
  0x8c   :  { %1475 = vmatpush1.bf16.msra.mxu1 %v3492_v23  ;;  %1398 = vmatprep.subr.bf16.mxu0 %v3503_v26  ;;  %v3581_v23 = vld [vmem:[#allocation5 + $0x2cc] ss:$16 sps:$4 sm:$0xff]  }
  0x8d   :  { %1476 = vmatprep.subr.bf16.mxu1 %v3500_v25  ;;  %v3579_v25 = vld [vmem:[#allocation5 + $0x2c8] ss:$16 sps:$4 sm:$0xff]   ;;  %v3584_v26 = vld [vmem:[#allocation5 + $0x4ec] ss:$16 sps:$4 sm:$0xff]  }
  0x8f   :  { %1399 = vmatpush1.bf16.msra.mxu0 %v3501_v28  ;;  %v3582_v28 = vld [vmem:[#allocation5 + $0x4e8] ss:$16 sps:$4 sm:$0xff]  }
  0x90   :  { %1477 = vmatpush1.bf16.msra.mxu1 %v3498_v27  ;;  %1400 = vmatprep.subr.bf16.mxu0 %v3509_v30  ;;  %v3587_v27 = vld [vmem:[#allocation5 + $0x2ac] ss:$16 sps:$4 sm:$0xff]  }
  0x91   :  { %1478 = vmatprep.subr.bf16.mxu1 %v3506_v29  ;;  %v3585_v29 = vld [vmem:[#allocation5 + $0x2a8] ss:$16 sps:$4 sm:$0xff]   ;;  %v3590_v30 = vld [vmem:[#allocation5 + $0x4cc] ss:$16 sps:$4 sm:$0xff]  }
  0x93   :  { %1401 = vmatpush1.bf16.msra.mxu0 %v3507_v32  ;;  %v3588_v32 = vld [vmem:[#allocation5 + $0x4c8] ss:$16 sps:$4 sm:$0xff]  }
  0x94   :  { %1479 = vmatpush1.bf16.msra.mxu1 %v3504_v31  ;;  %1402 = vmatprep.subr.bf16.mxu0 %v3515_v34  ;;  %v3593_v31 = vld [vmem:[#allocation5 + $0x28c] ss:$16 sps:$4 sm:$0xff]  }
  0x95   :  { %1480 = vmatprep.subr.bf16.mxu1 %v3512_v33  ;;  %v3591_v33 = vld [vmem:[#allocation5 + $0x288] ss:$16 sps:$4 sm:$0xff]   ;;  %v3596_v34 = vld [vmem:[#allocation5 + $0x4ac] ss:$16 sps:$4 sm:$0xff]  }
  0x97   :  { %1403 = vmatpush1.bf16.msra.mxu0 %v3513_v38  ;;  %v3597_v38 = vld [vmem:[#allocation5 + $0x268] ss:$16 sps:$4 sm:$0xff]  }
  0x98   :  { %1481 = vmatpush1.bf16.msra.mxu1 %v3510_v37  ;;  %1404 = vmatprep.subr.bf16.mxu0 %v3521_v40  ;;  %v3594_v37 = vld [vmem:[#allocation5 + $0x4a8] ss:$16 sps:$4 sm:$0xff]  }
  0x99   :  { %1482 = vmatprep.subr.bf16.mxu1 %v3518_v39  ;;  %v3605_v39 = vld [vmem:[#allocation5 + $0x24c] ss:$16 sps:$4 sm:$0xff]   ;;  %v3600_v40 = vld [vmem:[#allocation5 + $0x488] ss:$16 sps:$4 sm:$0xff]  }
  0x9b   :  { %1405 = vmatpush1.bf16.msra.mxu0 %v3519_v42  ;;  %v3611_v42 = vld [vmem:[#allocation5 + $0x22c] ss:$16 sps:$4 sm:$0xff]  }
  0x9c   :  { %1483 = vmatpush1.bf16.msra.mxu1 %v3516_v41  ;;  %1406 = vmatprep.subr.bf16.mxu0 %v3527_v44  ;;  %v3608_v41 = vld [vmem:[#allocation5 + $0x46c] ss:$16 sps:$4 sm:$0xff]   ;;  %v3609_v44 = vld [vmem:[#allocation5 + $0x228] ss:$16 sps:$4 sm:$0xff]  }
  0x9d   :  { %1484 = vmatprep.subr.bf16.mxu1 %v3524_v43  ;;  %v3606_v43 = vld [vmem:[#allocation5 + $0x468] ss:$16 sps:$4 sm:$0xff]  }
  0x9f   :  { %1407 = vmatpush2.bf16.msra.mxu0 %v3525_v46  ;;  %v3612_v46 = vld [vmem:[#allocation5 + $0x448] ss:$16 sps:$4 sm:$0xff]  }
  0xa0   :  { %1485 = vmatpush1.bf16.msra.mxu1 %v3522_v45  ;;  %1408 = vmatprep.subr.bf16.mxu0 %v3533_v48  ;;  %v3617_v45 = vld [vmem:[#allocation5 + $0x20c] ss:$16 sps:$4 sm:$0xff]  }
  0xa1   :  { %1486 = vmatprep.subr.bf16.mxu1 %v3530_v47  ;;  %v3615_v47 = vld [vmem:[#allocation5 + $0x208] ss:$16 sps:$4 sm:$0xff]   ;;  %v3620_v48 = vld [vmem:[#allocation5 + $0x42c] ss:$16 sps:$4 sm:$0xff]  }
  0xa3   :  { %1409 = vmatpush2.bf16.msra.mxu0 %v3531_v50  ;;  %v3618_v50 = vld [vmem:[#allocation5 + $0x428] ss:$16 sps:$4 sm:$0xff]  }
  0xa4   :  { %1487 = vmatpush1.bf16.msra.mxu1 %v3528_v49  ;;  %1410 = vmatprep.subr.bf16.mxu0 %v3539_v53  ;;  %v3623_v49 = vld [vmem:[#allocation5 + $0x3ec] ss:$16 sps:$4 sm:$0xff]  }
  0xa5   :  { %1488 = vmatprep.subr.bf16.mxu1 %v3536_v51  ;;  %v3621_v51 = vld [vmem:[#allocation5 + $0x3e8] ss:$16 sps:$4 sm:$0xff]   ;;  %v3626_v53 = vld [vmem:[#allocation5 + $0x40c] ss:$16 sps:$4 sm:$0xff]  }
  0xa7   :  { %1411 = vmatpush2.bf16.msra.mxu0 %v3537_v55  ;;  %v3624_v55 = vld [vmem:[#allocation5 + $0x408] ss:$16 sps:$4 sm:$0xff]  }
  0xa8   :  { %1489 = vmatpush2.bf16.msra.mxu1 %v3534_v54  ;;  %1412 = vmatprep.subr.bf16.mxu0 %v3545_v57  ;;  %v3629_v54 = vld [vmem:[#allocation5 + $0x3cc] ss:$16 sps:$4 sm:$0xff]  }
  0xa9   :  { %1490 = vmatprep.subr.bf16.mxu1 %v3542_v56  ;;  %v3627_v56 = vld [vmem:[#allocation5 + $0x3c8] ss:$16 sps:$4 sm:$0xff]   ;;  %v3632_v57 = vld [vmem:[#allocation5 + $0x5ec] ss:$16 sps:$4 sm:$0xff]  }
  0xab   :  { %1413 = vmatpush2.bf16.msra.mxu0 %v3543_v59  ;;  %v3630_v59 = vld [vmem:[#allocation5 + $0x5e8] ss:$16 sps:$4 sm:$0xff]  }
  0xac   :  { %1491 = vmatpush2.bf16.msra.mxu1 %v3540_v58  ;;  %1414 = vmatprep.subr.bf16.mxu0 %v3551_v61  ;;  %v3635_v58 = vld [vmem:[#allocation5 + $0x3ac] ss:$16 sps:$4 sm:$0xff]  }
  0xad   :  { %1492 = vmatprep.subr.bf16.mxu1 %v3548_v60  ;;  %v3633_v60 = vld [vmem:[#allocation5 + $0x3a8] ss:$16 sps:$4 sm:$0xff]   ;;  %v3638_v61 = vld [vmem:[#allocation5 + $0x5cc] ss:$16 sps:$4 sm:$0xff]  }
  0xaf   :  { %1415 = vmatpush2.bf16.msra.mxu0 %v3549_v63  ;;  %v3636_v63 = vld [vmem:[#allocation5 + $0x5c8] ss:$16 sps:$4 sm:$0xff]  }
  0xb0   :  { %1493 = vmatpush2.bf16.msra.mxu1 %v3546_v62  ;;  %1416 = vmatprep.subr.bf16.mxu0 %v3557_v1  ;;  %v3641_v62 = vld [vmem:[#allocation5 + $0x38c] ss:$16 sps:$4 sm:$0xff]  }
  0xb1   :  { %1494 = vmatprep.subr.bf16.mxu1 %v3554_v0  ;;  %v3639_v0 = vld [vmem:[#allocation5 + $0x388] ss:$16 sps:$4 sm:$0xff]   ;;  %v3644_v1 = vld [vmem:[#allocation5 + $0x5ac] ss:$16 sps:$4 sm:$0xff]  }
  0xb3   :  { %1417 = vmatpush2.bf16.msra.mxu0 %v3555_v3  ;;  %v3642_v3 = vld [vmem:[#allocation5 + $0x5a8] ss:$16 sps:$4 sm:$0xff]  }
  0xb4   :  { %1495 = vmatpush2.bf16.msra.mxu1 %v3552_v2  ;;  %1418 = vmatprep.subr.bf16.mxu0 %v3563_v5  ;;  %v3647_v2 = vld [vmem:[#allocation5 + $0x36c] ss:$16 sps:$4 sm:$0xff]  }
  0xb5   :  { %1496 = vmatprep.subr.bf16.mxu1 %v3560_v4  ;;  %v3645_v4 = vld [vmem:[#allocation5 + $0x368] ss:$16 sps:$4 sm:$0xff]   ;;  %v3650_v5 = vld [vmem:[#allocation5 + $0x58c] ss:$16 sps:$4 sm:$0xff]  }
  0xb7   :  { %1419 = vmatpush2.bf16.msra.mxu0 %v3561_v7  ;;  %v3648_v7 = vld [vmem:[#allocation5 + $0x588] ss:$16 sps:$4 sm:$0xff]  }
  0xb8   :  { %1497 = vmatpush2.bf16.msra.mxu1 %v3558_v6  ;;  %1420 = vmatprep.subr.bf16.mxu0 %v3569_v11  ;;  %v3653_v6 = vld [vmem:[#allocation5 + $0x34c] ss:$16 sps:$4 sm:$0xff]  }
  0xb9   :  { %1498 = vmatprep.subr.bf16.mxu1 %v3566_v10  ;;  %v3651_v10 = vld [vmem:[#allocation5 + $0x348] ss:$16 sps:$4 sm:$0xff]   ;;  %v3656_v11 = vld [vmem:[#allocation5 + $0x56c] ss:$16 sps:$4 sm:$0xff]  }
  0xbb   :  { %1421 = vmatpush2.bf16.msra.mxu0 %v3567_v13  ;;  %v3654_v13 = vld [vmem:[#allocation5 + $0x568] ss:$16 sps:$4 sm:$0xff]  }
  0xbc   :  { %1499 = vmatpush2.bf16.msra.mxu1 %v3564_v12  ;;  %1513 = vmatprep.subr.bf16.mxu0 %v3575_v17  ;;  %v3659_v12 = vld [vmem:[#allocation5 + $0x32c] ss:$16 sps:$4 sm:$0xff]  }
  0xbd   :  { %1500 = vmatprep.subr.bf16.mxu1 %v3572_v14  ;;  %v3657_v14 = vld [vmem:[#allocation5 + $0x328] ss:$16 sps:$4 sm:$0xff]   ;;  %v3665_v17 = vld [vmem:[#allocation5 + $0x30c] ss:$16 sps:$4 sm:$0xff]  }
  0xbe   :  { %1423 = vmatmul.mubr.bf16.vlgmr.msra.gmra.mxu0 %v4114_v20 }
  0xbf   :  { %1514 = vmatpush1.bf16.msra.mxu0 %v3573_v21  ;;  %1545 = vmatprep.mubr.bf16.mxu0 %v4095_v52  ;;  %v3602_v52 = vld [vmem:[#allocation5 + $0x48c] ss:$16 sps:$4 sm:$0xff]   ;;  %v3663_v21 = vld [vmem:[#allocation5 + $0x308] ss:$16 sps:$4 sm:$0xff]  }
  0xc0   :  { %1501 = vmatpush2.bf16.msra.mxu1 %v3570_v18  ;;  %1515 = vmatprep.subr.bf16.mxu0 %v3581_v23  ;;  %v3660_v18 = vld [vmem:[#allocation5 + $0x548] ss:$16 sps:$4 sm:$0xff]   ;;  %v3671_v23 = vld [vmem:[#allocation5 + $0x60c] ss:$16 sps:$4 sm:$0xff]  }
  0xc1   :  { %1502 = vmatprep.subr.bf16.mxu1 %v3578_v22  ;;  %v3668_v22 = vld [vmem:[#allocation5 + $0x52c] ss:$16 sps:$4 sm:$0xff]  }
  0xc3   :  { %1516 = vmatpush1.bf16.msra.mxu0 %v3579_v25  ;;  %v3669_v25 = vld [vmem:[#allocation5 + $0x608] ss:$16 sps:$4 sm:$0xff]  }
  0xc4   :  { %1503 = vmatpush2.bf16.msra.mxu1 %v3576_v24  ;;  %1517 = vmatprep.subr.bf16.mxu0 %v3587_v27  ;;  %v3666_v24 = vld [vmem:[#allocation5 + $0x528] ss:$16 sps:$4 sm:$0xff]  }
  0xc5   :  { %1554 = vmatprep.subr.bf16.mxu1 %v3584_v26  ;;  %v3674_v26 = vld [vmem:[#allocation5 + $0x50c] ss:$16 sps:$4 sm:$0xff]   ;;  %v3677_v27 = vld [vmem:[#allocation8 + $0xe4] ss:$16 sps:$4 sm:$0xff]  }
  0xc7   :  { %1505 = vmatmul.mubr.bf16.vlgmr.msra.gmra.mxu1 %v4099_v8  ;;  %1518 = vmatpush1.bf16.msra.mxu0 %v3585_v29  ;;  %v3603_v8 = vld [vmem:[#allocation5 + $0x248] ss:$16 sps:$4 sm:$0xff]   ;;  %v3675_v29 = vld [vmem:[#allocation8 + $0xe0] ss:$16 sps:$4 sm:$0xff]  }
  0xc8   :  { %1555 = vmatpush1.bf16.msra.mxu1 %v3582_v28  ;;  %1519 = vmatprep.subr.bf16.mxu0 %v3593_v31  ;;  %v3672_v28 = vld [vmem:[#allocation5 + $0x508] ss:$16 sps:$4 sm:$0xff]   ;;  %v3678_v31 = vld [vmem:[#allocation8 + $0xc0] ss:$16 sps:$4 sm:$0xff]  }
  0xc9   :  { %1556 = vmatprep.subr.bf16.mxu1 %v3590_v30  ;;  %1586 = vmatprep.mubr.bf16.mxu1 %v4111_v36  ;;  %v3614_v36 = vld [vmem:[#allocation5 + $0x44c] ss:$16 sps:$4 sm:$0xff]   ;;  %v3680_v30 = vld [vmem:[#allocation8 + $0xc4] ss:$16 sps:$4 sm:$0xff]  }
  0xcb   :  { %1520 = vmatpush1.bf16.msra.mxu0 %v3591_v33  ;;  %v3681_v33 = vld [vmem:[#allocation8 + $0xa0] ss:$16 sps:$4 sm:$0xff]  }
  0xcc   :  { %1557 = vmatpush1.bf16.msra.mxu1 %v3588_v32  ;;  %1521 = vmatprep.subr.bf16.mxu0 %v3599_v35  ;;  %v3683_v32 = vld [vmem:[#allocation8 + $0xa4] ss:$16 sps:$4 sm:$0xff]  }
  0xcd   :  { %1558 = vmatprep.subr.bf16.mxu1 %v3596_v34  ;;  %v3684_v34 = vld [vmem:[#allocation8 + $0x80] ss:$16 sps:$4 sm:$0xff]   ;;  %v3731_v35 = vld [vmem:[#allocation8 + $0x2e4] ss:$16 sps:$4 sm:$0xff]  }
  0xcf   :  { %1522 = vmatpush1.bf16.msra.mxu0 %v3597_v38  ;;  %v3735_v38 = vld [vmem:[#allocation8 + $0x2c0] ss:$16 sps:$4 sm:$0xff]  }
  0xd0   :  { %1559 = vmatpush1.bf16.msra.mxu1 %v3594_v37  ;;  %1523 = vmatprep.subr.bf16.mxu0 %v3605_v39  ;;  %v3689_v37 = vld [vmem:[#allocation8 + $0x64] ss:$16 sps:$4 sm:$0xff]   ;;  %v3690_v39 = vld [vmem:[#allocation8 + $0x40] ss:$16 sps:$4 sm:$0xff]  }
  0xd1   :  { %1560 = vmatprep.subr.bf16.mxu1 %v3602_v52  ;;  %v3737_v52 = vld [vmem:[#allocation8 + $0x2c4] ss:$16 sps:$4 sm:$0xff]  }
  0xd3   :  { %1524 = vmatpush1.bf16.msra.mxu0 %v3603_v8  ;;  %v3743_v8 = vld [vmem:[#allocation8 + $0x2a4] ss:$16 sps:$4 sm:$0xff]  }
  0xd4   :  { %1561 = vmatpush1.bf16.msra.mxu1 %v3600_v40  ;;  %1525 = vmatprep.subr.bf16.mxu0 %v3611_v42  ;;  %v3741_v40 = vld [vmem:[#allocation8 + $0x2a0] ss:$16 sps:$4 sm:$0xff]  }
  0xd5   :  { %1562 = vmatprep.subr.bf16.mxu1 %v3608_v41  ;;  %v3695_v41 = vld [vmem:[#allocation8 + $0x24] ss:$16 sps:$4 sm:$0xff]   ;;  %v3693_v42 = vld [vmem:[#allocation8 + $0x20] ss:$16 sps:$4 sm:$0xff]  }
  0xd7   :  { %1526 = vmatpush1.bf16.msra.mxu0 %v3609_v44  ;;  %v3749_v44 = vld [vmem:[#allocation8 + $0x284] ss:$16 sps:$4 sm:$0xff]  }
  0xd8   :  { %1563 = vmatpush1.bf16.msra.mxu1 %v3606_v43  ;;  %1527 = vmatprep.subr.bf16.mxu0 %v3617_v45  ;;  %v3747_v43 = vld [vmem:[#allocation8 + $0x280] ss:$16 sps:$4 sm:$0xff]  }
  0xd9   :  { %1564 = vmatprep.subr.bf16.mxu1 %v3614_v36  ;;  %v3698_v36 = vld [vmem:[#allocation8 + $0x4] ss:$16 sps:$4 sm:$0xff]   ;;  %v3696_v45 = vld [vmem:[#allocation8] ss:$16 sps:$4 sm:$0xff]  }
  0xdb   :  { %1528 = vmatpush1.bf16.msra.mxu0 %v3615_v47  ;;  %v3755_v47 = vld [vmem:[#allocation8 + $0x264] ss:$16 sps:$4 sm:$0xff]  }
  0xdc   :  { %1565 = vmatpush1.bf16.msra.mxu1 %v3612_v46  ;;  %1529 = vmatprep.subr.bf16.mxu0 %v3623_v49  ;;  %v3753_v46 = vld [vmem:[#allocation8 + $0x260] ss:$16 sps:$4 sm:$0xff]  }
  0xdd   :  { %1566 = vmatprep.subr.bf16.mxu1 %v3620_v48  ;;  %v3701_v48 = vld [vmem:[#allocation8 + $0x1e4] ss:$16 sps:$4 sm:$0xff]   ;;  %v3699_v49 = vld [vmem:[#allocation8 + $0x1e0] ss:$16 sps:$4 sm:$0xff]  }
  0xdf   :  { %1530 = vmatpush2.bf16.msra.mxu0 %v3621_v51  ;;  %v3761_v51 = vld [vmem:[#allocation8 + $0x244] ss:$16 sps:$4 sm:$0xff]  }
  0xe0   :  { %1567 = vmatpush1.bf16.msra.mxu1 %v3618_v50  ;;  %1531 = vmatprep.subr.bf16.mxu0 %v3629_v54  ;;  %v3759_v50 = vld [vmem:[#allocation8 + $0x240] ss:$16 sps:$4 sm:$0xff]  }
  0xe1   :  { %1568 = vmatprep.subr.bf16.mxu1 %v3626_v53  ;;  %v3704_v53 = vld [vmem:[#allocation8 + $0x1c4] ss:$16 sps:$4 sm:$0xff]   ;;  %v3702_v54 = vld [vmem:[#allocation8 + $0x1c0] ss:$16 sps:$4 sm:$0xff]  }
  0xe3   :  { %1532 = vmatpush2.bf16.msra.mxu0 %v3627_v56  ;;  %v3767_v56 = vld [vmem:[#allocation8 + $0x224] ss:$16 sps:$4 sm:$0xff]  }
  0xe4   :  { %1569 = vmatpush1.bf16.msra.mxu1 %v3624_v55  ;;  %1533 = vmatprep.subr.bf16.mxu0 %v3635_v58  ;;  %v3765_v55 = vld [vmem:[#allocation8 + $0x220] ss:$16 sps:$4 sm:$0xff]  }
  0xe5   :  { %1570 = vmatprep.subr.bf16.mxu1 %v3632_v57  ;;  %v3707_v57 = vld [vmem:[#allocation8 + $0x1a4] ss:$16 sps:$4 sm:$0xff]   ;;  %v3705_v58 = vld [vmem:[#allocation8 + $0x1a0] ss:$16 sps:$4 sm:$0xff]  }
  0xe7   :  { %1534 = vmatpush2.bf16.msra.mxu0 %v3633_v60  ;;  %v3773_v60 = vld [vmem:[#allocation8 + $0x204] ss:$16 sps:$4 sm:$0xff]  }
  0xe8   :  { %1571 = vmatpush2.bf16.msra.mxu1 %v3630_v59  ;;  %1535 = vmatprep.subr.bf16.mxu0 %v3641_v62  ;;  %v3771_v59 = vld [vmem:[#allocation8 + $0x200] ss:$16 sps:$4 sm:$0xff]  }
  0xe9   :  { %1572 = vmatprep.subr.bf16.mxu1 %v3638_v61  ;;  %v3710_v61 = vld [vmem:[#allocation8 + $0x184] ss:$16 sps:$4 sm:$0xff]   ;;  %v3708_v62 = vld [vmem:[#allocation8 + $0x180] ss:$16 sps:$4 sm:$0xff]  }
  0xeb   :  { %1536 = vmatpush2.bf16.msra.mxu0 %v3639_v0  ;;  %v3779_v0 = vld [vmem:[#allocation8 + $0x3e4] ss:$16 sps:$4 sm:$0xff]  }
  0xec   :  { %1573 = vmatpush2.bf16.msra.mxu1 %v3636_v63  ;;  %1537 = vmatprep.subr.bf16.mxu0 %v3647_v2  ;;  %v3777_v63 = vld [vmem:[#allocation8 + $0x3e0] ss:$16 sps:$4 sm:$0xff]  }
  0xed   :  { %1574 = vmatprep.subr.bf16.mxu1 %v3644_v1  ;;  %v3713_v1 = vld [vmem:[#allocation8 + $0x164] ss:$16 sps:$4 sm:$0xff]   ;;  %v3711_v2 = vld [vmem:[#allocation8 + $0x160] ss:$16 sps:$4 sm:$0xff]  }
  0xef   :  { %1538 = vmatpush2.bf16.msra.mxu0 %v3645_v4  ;;  %v3785_v4 = vld [vmem:[#allocation8 + $0x3c4] ss:$16 sps:$4 sm:$0xff]  }
  0xf0   :  { %1575 = vmatpush2.bf16.msra.mxu1 %v3642_v3  ;;  %1539 = vmatprep.subr.bf16.mxu0 %v3653_v6  ;;  %v3783_v3 = vld [vmem:[#allocation8 + $0x3c0] ss:$16 sps:$4 sm:$0xff]  }
  0xf1   :  { %1576 = vmatprep.subr.bf16.mxu1 %v3650_v5  ;;  %v3716_v5 = vld [vmem:[#allocation8 + $0x144] ss:$16 sps:$4 sm:$0xff]   ;;  %v3714_v6 = vld [vmem:[#allocation8 + $0x140] ss:$16 sps:$4 sm:$0xff]  }
  0xf3   :  { %1540 = vmatpush2.bf16.msra.mxu0 %v3651_v10  ;;  %v3791_v10 = vld [vmem:[#allocation8 + $0x3a4] ss:$16 sps:$4 sm:$0xff]  }
  0xf4   :  { %1577 = vmatpush2.bf16.msra.mxu1 %v3648_v7  ;;  %1541 = vmatprep.subr.bf16.mxu0 %v3659_v12  ;;  %v3789_v7 = vld [vmem:[#allocation8 + $0x3a0] ss:$16 sps:$4 sm:$0xff]  }
  0xf5   :  { %1578 = vmatprep.subr.bf16.mxu1 %v3656_v11  ;;  %v3719_v11 = vld [vmem:[#allocation8 + $0x124] ss:$16 sps:$4 sm:$0xff]   ;;  %v3717_v12 = vld [vmem:[#allocation8 + $0x120] ss:$16 sps:$4 sm:$0xff]  }
  0xf7   :  { %1542 = vmatpush2.bf16.msra.mxu0 %v3657_v14  ;;  %v3797_v14 = vld [vmem:[#allocation8 + $0x384] ss:$16 sps:$4 sm:$0xff]  }
  0xf8   :  { %1579 = vmatpush2.bf16.msra.mxu1 %v3654_v13  ;;  %1543 = vmatprep.subr.bf16.mxu0 %v3665_v17  ;;  %v3795_v13 = vld [vmem:[#allocation8 + $0x380] ss:$16 sps:$4 sm:$0xff]  }
  0xf9   :  { %1580 = vmatprep.subr.bf16.mxu1 %v3662_v15  ;;  %v3722_v15 = vld [vmem:[#allocation8 + $0x104] ss:$16 sps:$4 sm:$0xff]  }
  0xfb   :  { %1544 = vmatpush2.bf16.msra.mxu0 %v3663_v21  ;;  %v3720_v21 = vld [vmem:[#allocation8 + $0x100] ss:$16 sps:$4 sm:$0xff]  }
  0xfc   :  { %1581 = vmatpush2.bf16.msra.mxu1 %v3660_v18  ;;  %1609 = vmatprep.subr.bf16.mxu0 %v3671_v23 }
  0xfd   :  { %1582 = vmatprep.subr.bf16.mxu1 %v3668_v22  ;;  %v3803_v22 = vld [vmem:[#allocation8 + $0x364] ss:$16 sps:$4 sm:$0xff]  }
  0xfe   :  { %1546 = vmatmul.mubr.bf16.vlgmr.msra.gmra.mxu0 %v4101_v9  ;;  %v3686_v9 = vld [vmem:[#allocation8 + $0x84] ss:$16 sps:$4 sm:$0xff]  }
  0xff   :  { %1610 = vmatpush1.bf16.msra.mxu0 %v3669_v25  ;;  %1627 = vmatprep.mubr.bf16.mxu0 %v4036_v16  ;;  %v3729_v16 = vld [vmem:[#allocation8 + $0x2e0] ss:$16 sps:$4 sm:$0xff]   ;;  %v3725_v25 = vld [vmem:[#allocation8 + $0xec] ss:$16 sps:$4 sm:$0xff]  }
 0x100   :  { %1583 = vmatpush2.bf16.msra.mxu1 %v3666_v24  ;;  %2434 = vmatprep.subr.bf16.mxu0 %v3677_v27 }
 0x101   :  { %1584 = vmatprep.subr.bf16.mxu1 %v3674_v26  ;;  %v3801_v26 = vld [vmem:[#allocation8 + $0x360] ss:$16 sps:$4 sm:$0xff]  }
 0x104   :  { %1585 = vmatpush2.bf16.msra.mxu1 %v3672_v28 }
 0x105   :  { %2475 = vmatprep.subr.bf16.mxu1 %v3731_v35 }
 0x106   :  { %3164 = vmatmul.mubr.msk.bf16.vlgmr.msra.gmra.mxu0 %vm1304_vm0, %v4106_v19  ;;  %v3692_v19 = vld [vmem:[#allocation8 + $0x44] ss:$16 sps:$4 sm:$0xff]  }
 0x107   :  { %1587 = vmatmul.mubr.bf16.vlgmr.msra.gmra.mxu1 %v4114_v20  ;;  %2435 = vmatpush1.bf16.msra.mxu0 %v3675_v29  ;;  %v3687_v20 = vld [vmem:[#allocation8 + $0x60] ss:$16 sps:$4 sm:$0xff]   ;;  %v3809_v29 = vld [vmem:[#allocation8 + $0x344] ss:$16 sps:$4 sm:$0xff]  }
 0x108   :  { %2436 = vmatprep.subr.bf16.mxu0 %v3680_v30  ;;  %2476 = vmatpush1.bf16.msra.mxu1 %v3729_v16  ;;  %v3813_v16 = vld [vmem:[#allocation8 + $0x320] ss:$16 sps:$4 sm:$0xff]  }
 0x109   :  { %2477 = vmatprep.subr.bf16.mxu1 %v3737_v52  ;;  %v3821_v52 = vld [vmem:[#allocation8 + $0x2ec] ss:$16 sps:$4 sm:$0xff]  }
 0x10b   :  { %2437 = vmatpush1.bf16.msra.mxu0 %v3678_v31 }
 0x10c   :  { %2438 = vmatprep.subr.bf16.mxu0 %v3683_v32  ;;  %2478 = vmatpush1.bf16.msra.mxu1 %v3735_v38  ;;  %v3807_v32 = vld [vmem:[#allocation8 + $0x340] ss:$16 sps:$4 sm:$0xff]  }
 0x10d   :  { %2479 = vmatprep.subr.bf16.mxu1 %v3743_v8  ;;  %v3816_v38 = vld [vmem:[#allocation8 + $0x300] ss:$16 sps:$4 sm:$0xff]   ;;  %v4128_v8 = vld [vmem:[#allocation7] sm:$0xf] }
 0x10f   :  { %2439 = vmatpush1.bf16.msra.mxu0 %v3681_v33 }
 0x110   :  { %2440 = vmatprep.subr.bf16.mxu0 %v3686_v9  ;;  %2480 = vmatpush1.bf16.msra.mxu1 %v3741_v40  ;;  %v3815_v9 = vld [vmem:[#allocation8 + $0x324] ss:$16 sps:$4 sm:$0xff]  }
 0x111   :  { %2481 = vmatprep.subr.bf16.mxu1 %v3749_v44 }
 0x113   :  { %2441 = vmatpush1.bf16.msra.mxu0 %v3684_v34 }
 0x114   :  { %2442 = vmatprep.subr.bf16.mxu0 %v3689_v37  ;;  %2482 = vmatpush1.bf16.msra.mxu1 %v3747_v43  ;;  %v3818_v37 = vld [vmem:[#allocation8 + $0x304] ss:$16 sps:$4 sm:$0xff]  }
 0x115   :  { %2483 = vmatprep.subr.bf16.mxu1 %v3755_v47 }
 0x117   :  { %2443 = vmatpush1.bf16.msra.mxu0 %v3687_v20 }
 0x118   :  { %2444 = vmatprep.subr.bf16.mxu0 %v3692_v19  ;;  %2484 = vmatpush1.bf16.msra.mxu1 %v3753_v46  ;;  %v304_v19 = vlaneseq }
 0x119   :  { %2485 = vmatprep.subr.bf16.mxu1 %v3761_v51 }
 0x11b   :  { %2445 = vmatpush1.bf16.msra.mxu0 %v3690_v39  ;;  %v4125_v39 = vshrl.u32 %v304_v19, 7 }
 0x11c   :  { %2446 = vmatprep.subr.bf16.mxu0 %v3695_v41  ;;  %2486 = vmatpush1.bf16.msra.mxu1 %v3759_v50 }
 0x11d   :  { %2487 = vmatprep.subr.bf16.mxu1 %v3767_v56  ;;  %v306_v40 = vsub.s32 0, %v4125_v39  ;;  %v310_v41 = vsub.s32 1, %v4125_v39 }
 0x11f   :  { %2447 = vmatpush1.bf16.msra.mxu0 %v3693_v42  ;;  %v307_v42 = vrot.slane %v4128_v8, %v306_v40  ;;  %v311_v43 = vrot.slane %v4128_v8, %v310_v41 }
 0x120   :  { %2448 = vmatprep.subr.bf16.mxu0 %v3698_v36  ;;  %2488 = vmatpush1.bf16.msra.mxu1 %v3765_v55 }
 0x121   :  { %2489 = vmatprep.subr.bf16.mxu1 %v3773_v60  ;;  %v3723_v60 = vld [vmem:[#allocation8 + $0xe8] ss:$16 sps:$4 sm:$0xff]  }
 0x123   :  { %2449 = vmatpush1.bf16.msra.mxu0 %v3696_v45 }
 0x124   :  { %2450 = vmatprep.subr.bf16.mxu0 %v3701_v48  ;;  %2490 = vmatpush1.bf16.msra.mxu1 %v3771_v59 }
 0x125   :  { %2491 = vmatprep.subr.bf16.mxu1 %v3779_v0 }
 0x127   :  { %2451 = vmatpush2.bf16.msra.mxu0 %v3699_v49 }
 0x128   :  { %2452 = vmatprep.subr.bf16.mxu0 %v3704_v53  ;;  %2492 = vmatpush2.bf16.msra.mxu1 %v3777_v63  ;;  %v3728_v63 = vld [vmem:[#allocation8 + $0xcc] ss:$16 sps:$4 sm:$0xff]  }
 0x129   :  { %2493 = vmatprep.subr.bf16.mxu1 %v3785_v4  ;;  %v3732_v4 = vld [vmem:[#allocation8 + $0xa8] ss:$16 sps:$4 sm:$0xff]  }
 0x12b   :  { %2453 = vmatpush2.bf16.msra.mxu0 %v3702_v54 }
 0x12c   :  { %2454 = vmatprep.subr.bf16.mxu0 %v3707_v57  ;;  %2494 = vmatpush2.bf16.msra.mxu1 %v3783_v3  ;;  %v3734_v3 = vld [vmem:[#allocation8 + $0xac] ss:$16 sps:$4 sm:$0xff]  }
 0x12d   :  { %2495 = vmatprep.subr.bf16.mxu1 %v3791_v10  ;;  %v3744_v10 = vld [vmem:[#allocation8 + $0x68] ss:$16 sps:$4 sm:$0xff]  }
 0x12f   :  { %2455 = vmatpush2.bf16.msra.mxu0 %v3705_v58 }
 0x130   :  { %2456 = vmatprep.subr.bf16.mxu0 %v3710_v61  ;;  %2496 = vmatpush2.bf16.msra.mxu1 %v3789_v7  ;;  %v3746_v7 = vld [vmem:[#allocation8 + $0x6c] ss:$16 sps:$4 sm:$0xff]  }
 0x131   :  { %2497 = vmatprep.subr.bf16.mxu1 %v3797_v14  ;;  %v3756_v14 = vld [vmem:[#allocation8 + $0x28] ss:$16 sps:$4 sm:$0xff]  }
 0x133   :  { %2457 = vmatpush2.bf16.msra.mxu0 %v3708_v62 }
 0x134   :  { %2458 = vmatprep.subr.bf16.mxu0 %v3713_v1  ;;  %2498 = vmatpush2.bf16.msra.mxu1 %v3795_v13  ;;  %v3726_v1 = vld [vmem:[#allocation8 + $0xc8] ss:$16 sps:$4 sm:$0xff]   ;;  %v3758_v13 = vld [vmem:[#allocation8 + $0x2c] ss:$16 sps:$4 sm:$0xff]  }
 0x135   :  { %2499 = vmatprep.subr.bf16.mxu1 %v3803_v22  ;;  %v3776_v22 = vld [vmem:[#allocation8 + $0x1cc] ss:$16 sps:$4 sm:$0xff]  }
 0x137   :  { %2459 = vmatpush2.bf16.msra.mxu0 %v3711_v2 }
 0x138   :  { %2460 = vmatprep.subr.bf16.mxu0 %v3716_v5  ;;  %2500 = vmatpush2.bf16.msra.mxu1 %v3801_v26  ;;  %v3740_v5 = vld [vmem:[#allocation8 + $0x8c] ss:$16 sps:$4 sm:$0xff]  }
 0x139   :  { %2501 = vmatprep.subr.bf16.mxu1 %v3809_v29  ;;  %v3788_v26 = vld [vmem:[#allocation8 + $0x18c] ss:$16 sps:$4 sm:$0xff]   ;;  %v3792_v29 = vld [vmem:[#allocation8 + $0x168] ss:$16 sps:$4 sm:$0xff]  }
 0x13b   :  { %2461 = vmatpush2.bf16.msra.mxu0 %v3714_v6  ;;  %v3738_v6 = vld [vmem:[#allocation8 + $0x88] ss:$16 sps:$4 sm:$0xff]  }
 0x13c   :  { %2462 = vmatprep.subr.bf16.mxu0 %v3719_v11  ;;  %2502 = vmatpush2.bf16.msra.mxu1 %v3807_v32  ;;  %v3752_v11 = vld [vmem:[#allocation8 + $0x4c] ss:$16 sps:$4 sm:$0xff]   ;;  %v3798_v32 = vld [vmem:[#allocation8 + $0x148] ss:$16 sps:$4 sm:$0xff]  }
 0x13d   :  { %2503 = vmatprep.subr.bf16.mxu1 %v3815_v9  ;;  %v318_v9 = vsub.s32 3, %v4125_v39 }
 0x13e   :  { %v1342_v17 = vpop.f32.mrf.mxu0 }
 0x13f   :  { %v1383_v18 = vpop.f32.mrf.mxu1  ;;  %2463 = vmatpush2.bf16.msra.mxu0 %v3717_v12  ;;  %v1343_v44 = vadd.f32 %v1342_v17, %v307_v42  ;;  %v3750_v12 = vld [vmem:[#allocation8 + $0x48] ss:$16 sps:$4 sm:$0xff]  }
 0x140   :  { %v1344_v23 = vpop.f32.mrf.mxu0  ;;  %2464 = vmatprep.subr.bf16.mxu0 %v3722_v15  ;;  %2504 = vmatpush2.bf16.msra.mxu1 %v3813_v16  ;;  %v3764_v15 = vld [vmem:[#allocation8 + $0xc] ss:$16 sps:$4 sm:$0xff]   ;;  %v3762_v17 = vld [vmem:[#allocation8 + $0x8] ss:$16 sps:$4 sm:$0xff]  }
 0x141   :  { %v1385_v24 = vpop.f32.mrf.mxu1  ;;  %2505 = vmatprep.subr.bf16.mxu1 %v3818_v37  ;;  %v1345_v36 = vadd.f32 %v1344_v23, %v311_v43  ;;  %v1384_v45 = vadd.f32 %v1383_v18, %v1343_v44  ;;  %v3770_v18 = vld [vmem:[#allocation8 + $0x1ec] ss:$16 sps:$4 sm:$0xff]   ;;  %v3774_v23 = vld [vmem:[#allocation8 + $0x1c8] ss:$16 sps:$4 sm:$0xff]  }
 0x142   :  { %v1346_v27 = vpop.f32.mrf.mxu0  ;;  %v3810_v42 = vld [vmem:[#allocation8 + $0x108] ss:$16 sps:$4 sm:$0xff]  }
 0x143   :  { %v1387_v28 = vpop.f32.mrf.mxu1  ;;  %2465 = vmatpush2.bf16.msra.mxu0 %v3720_v21  ;;  %v1386_v47 = vadd.f32 %v1385_v24, %v1345_v36  ;;  %v3768_v21 = vld [vmem:[#allocation8 + $0x1e8] ss:$16 sps:$4 sm:$0xff]   ;;  %v3782_v24 = vld [vmem:[#allocation8 + $0x1ac] ss:$16 sps:$4 sm:$0xff]  }
 0x144   :  { %v1347_v30 = vpop.f32.mrf.mxu0  ;;  %2516 = vmatprep.subr.bf16.mxu0 %v3725_v25  ;;  %2506 = vmatpush2.bf16.msra.mxu1 %v3816_v38  ;;  %v3780_v25 = vld [vmem:[#allocation8 + $0x1a8] ss:$16 sps:$4 sm:$0xff]   ;;  %v3794_v28 = vld [vmem:[#allocation8 + $0x16c] ss:$16 sps:$4 sm:$0xff]   ;;  %v319_v38 = vrot.slane %v4128_v8, %v318_v9 }
 0x145   :  { %v1388_v31 = vpop.f32.mrf.mxu1  ;;  %2557 = vmatprep.subr.bf16.mxu1 %v3821_v52  ;;  %v3786_v27 = vld [vmem:[#allocation8 + $0x188] ss:$16 sps:$4 sm:$0xff]   ;;  %v3800_v30 = vld [vmem:[#allocation8 + $0x14c] ss:$16 sps:$4 sm:$0xff]  }
 0x146   :  { %v314_v31 = vsub.s32 2, %v4125_v39 }
 0x147   :  { %v1465_v33 = vpop.f32.mrf.mxu1 }
 0x148   :  { %v315_v16 = vrot.slane %v4128_v8, %v314_v31 }
 0x149   :  { %v1467_v34 = vpop.f32.mrf.mxu1 }
 0x14b   :  { %v1469_v35 = vpop.f32.mrf.mxu1 }
 0x14c   :  { %v3804_v35 = vld [vmem:[#allocation8 + $0x128] ss:$16 sps:$4 sm:$0xff]  }
 0x14d   :  { %v1470_v20 = vpop.f32.mrf.mxu1 }
 0x14e   :  { %v3812_v20 = vld [vmem:[#allocation8 + $0x10c] ss:$16 sps:$4 sm:$0xff]  }
 0x17e   :  { %v1424_v46 = vpop.f32.mrf.mxu0 }
 0x17f   :  { %v1425_v48 = vadd.f32 %v1424_v46, %v1384_v45 }
 0x180   :  { %v1426_v49 = vpop.f32.mrf.mxu0 }
 0x181   :  { %v1466_v50 = vadd.f32 %v1465_v33, %v1425_v48  ;;  %v1427_v51 = vadd.f32 %v1426_v49, %v1386_v47  ;;  %v3806_v33 = vld [vmem:[#allocation8 + $0x12c] ss:$16 sps:$4 sm:$0xff]  }
 0x182   :  { %v1428_v53 = vpop.f32.mrf.mxu0 }
 0x183   :  { %v1468_v54 = vadd.f32 %v1467_v34, %v1427_v51  ;;  %v1636_v55 = vmax.f32 %v1466_v50, 0.0 }
 0x184   :  { %v1429_v56 = vpop.f32.mrf.mxu0 }
 0x185   :  { %v1637_v57 = vmax.f32 %v1468_v54, 0.0  ;;  %v4139_v61 = vpack.c.bf16 %v1636_v55, %v1636_v55 }
 0x187   :  { %v4137_v58 = vpop.f32.mrf.mxu1  ;;  %v1641_v59 = vpack.c.bf16 %v1637_v57, %v1637_v57 }
 0x188   :  { %v1507_v19 = vadd.f32 %v4137_v58, %v315_v16  ;;  %v3857_v16 = vld [vmem:[#allocation8 + $0x36c] ss:$16 sps:$4 sm:$0xff]  }
 0x189   :  { %v4141_v62 = vpop.f32.mrf.mxu1  ;;  %2466 = vmatprep.mubr.bf16.mxu0 %v1641_v59 }
 0x18a   :  { %2467 = vmatmul.mubr.bf16.vlgmr.msra.gmra.mxu0 %v4139_v61  ;;  %v1509_v44 = vadd.f32 %v4141_v62, %v319_v38  ;;  %v3819_v62 = vld [vmem:[#allocation8 + $0x2e8] ss:$16 sps:$4 sm:$0xff]   ;;  %v3863_v38 = vld [vmem:[#allocation8 + $0x32c] ss:$16 sps:$4 sm:$0xff]  }
 0x18b   :  { %v1510_v0 = vpop.f32.mrf.mxu1  ;;  %2517 = vmatpush1.bf16.msra.mxu0 %v3723_v60  ;;  %2548 = vmatprep.mubr.bf16.mxu0 %v1641_v59 }
 0x18c   :  { %2518 = vmatprep.subr.bf16.mxu0 %v3728_v63  ;;  %v3824_v0 = vld [vmem:[#allocation8 + $0x2cc] ss:$16 sps:$4 sm:$0xff]  }
 0x18d   :  { %v1511_v2 = vpop.f32.mrf.mxu1 }
 0x18e   :  { %v3868_v2 = vld [vmem:[#allocation10 + $0x38] sm:$0xff]  }
 0x18f   :  { %2519 = vmatpush1.bf16.msra.mxu0 %v3726_v1  ;;  %v3867_v1 = vld [vmem:[#allocation10 + $0x78] sm:$0xff]  }
 0x190   :  { %2520 = vmatprep.subr.bf16.mxu0 %v3734_v3  ;;  %v3869_v3 = vld [vmem:[#allocation10 + $0x70] sm:$0xff]  }
 0x193   :  { %2521 = vmatpush1.bf16.msra.mxu0 %v3732_v4  ;;  %v3827_v4 = vld [vmem:[#allocation8 + $0x2ac] ss:$16 sps:$4 sm:$0xff]  }
 0x194   :  { %2522 = vmatprep.subr.bf16.mxu0 %v3740_v5  ;;  %v3870_v5 = vld [vmem:[#allocation10 + $0x30] sm:$0xff]  }
 0x197   :  { %2523 = vmatpush1.bf16.msra.mxu0 %v3738_v6  ;;  %v3871_v6 = vld [vmem:[#allocation10 + $0x68] sm:$0xff]  }
 0x198   :  { %2524 = vmatprep.subr.bf16.mxu0 %v3746_v7  ;;  %v3825_v7 = vld [vmem:[#allocation8 + $0x2a8] ss:$16 sps:$4 sm:$0xff]  }
 0x19b   :  { %2525 = vmatpush1.bf16.msra.mxu0 %v3744_v10  ;;  %v3830_v10 = vld [vmem:[#allocation8 + $0x28c] ss:$16 sps:$4 sm:$0xff]  }
 0x19c   :  { %2526 = vmatprep.subr.bf16.mxu0 %v3752_v11  ;;  %v3872_v11 = vld [vmem:[#allocation10 + $0x28] sm:$0xff]  }
 0x19f   :  { %2527 = vmatpush1.bf16.msra.mxu0 %v3750_v12  ;;  %v3873_v12 = vld [vmem:[#allocation10 + $0x60] sm:$0xff]  }
 0x1a0   :  { %2528 = vmatprep.subr.bf16.mxu0 %v3758_v13  ;;  %v3828_v13 = vld [vmem:[#allocation8 + $0x288] ss:$16 sps:$4 sm:$0xff]  }
 0x1a3   :  { %2529 = vmatpush1.bf16.msra.mxu0 %v3756_v14  ;;  %v3833_v14 = vld [vmem:[#allocation8 + $0x26c] ss:$16 sps:$4 sm:$0xff]  }
 0x1a4   :  { %2530 = vmatprep.subr.bf16.mxu0 %v3764_v15  ;;  %v3874_v15 = vld [vmem:[#allocation10 + $0x20] sm:$0xff]  }
 0x1a7   :  { %2531 = vmatpush1.bf16.msra.mxu0 %v3762_v17  ;;  %v3831_v17 = vld [vmem:[#allocation8 + $0x268] ss:$16 sps:$4 sm:$0xff]  }
 0x1a8   :  { %2532 = vmatprep.subr.bf16.mxu0 %v3770_v18  ;;  %v3836_v18 = vld [vmem:[#allocation8 + $0x24c] ss:$16 sps:$4 sm:$0xff]  }
 0x1ab   :  { %2533 = vmatpush2.bf16.msra.mxu0 %v3768_v21  ;;  %v3834_v21 = vld [vmem:[#allocation8 + $0x248] ss:$16 sps:$4 sm:$0xff]  }
 0x1ac   :  { %2534 = vmatprep.subr.bf16.mxu0 %v3776_v22  ;;  %v3839_v22 = vld [vmem:[#allocation8 + $0x22c] ss:$16 sps:$4 sm:$0xff]  }
 0x1af   :  { %2535 = vmatpush2.bf16.msra.mxu0 %v3774_v23  ;;  %v3837_v23 = vld [vmem:[#allocation8 + $0x228] ss:$16 sps:$4 sm:$0xff]  }
 0x1b0   :  { %2536 = vmatprep.subr.bf16.mxu0 %v3782_v24  ;;  %v3842_v24 = vld [vmem:[#allocation8 + $0x20c] ss:$16 sps:$4 sm:$0xff]  }
 0x1b3   :  { %2537 = vmatpush2.bf16.msra.mxu0 %v3780_v25  ;;  %v3840_v25 = vld [vmem:[#allocation8 + $0x208] ss:$16 sps:$4 sm:$0xff]  }
 0x1b4   :  { %2538 = vmatprep.subr.bf16.mxu0 %v3788_v26  ;;  %v3845_v26 = vld [vmem:[#allocation8 + $0x3ec] ss:$16 sps:$4 sm:$0xff]  }
 0x1b7   :  { %2539 = vmatpush2.bf16.msra.mxu0 %v3786_v27  ;;  %v3843_v27 = vld [vmem:[#allocation8 + $0x3e8] ss:$16 sps:$4 sm:$0xff]  }
 0x1b8   :  { %2540 = vmatprep.subr.bf16.mxu0 %v3794_v28  ;;  %v3848_v28 = vld [vmem:[#allocation8 + $0x3cc] ss:$16 sps:$4 sm:$0xff]  }
 0x1bb   :  { %2541 = vmatpush2.bf16.msra.mxu0 %v3792_v29  ;;  %v3846_v29 = vld [vmem:[#allocation8 + $0x3c8] ss:$16 sps:$4 sm:$0xff]  }
 0x1bc   :  { %2542 = vmatprep.subr.bf16.mxu0 %v3800_v30  ;;  %v3851_v30 = vld [vmem:[#allocation8 + $0x3ac] ss:$16 sps:$4 sm:$0xff]  }
 0x1be   :  { %v1547_v34 = vpop.f32.mrf.mxu0 }
 0x1bf   :  { %2543 = vmatpush2.bf16.msra.mxu0 %v3798_v32  ;;  %v1548_v36 = vadd.f32 %v1547_v34, %v1507_v19  ;;  %v3849_v32 = vld [vmem:[#allocation8 + $0x3a8] ss:$16 sps:$4 sm:$0xff]   ;;  %v3866_v19 = vld [vmem:[#allocation8 + $0x30c] ss:$16 sps:$4 sm:$0xff]  }
 0x1c0   :  { %v1549_v37 = vpop.f32.mrf.mxu0  ;;  %2544 = vmatprep.subr.bf16.mxu0 %v3806_v33  ;;  %v3854_v33 = vld [vmem:[#allocation8 + $0x38c] ss:$16 sps:$4 sm:$0xff]   ;;  %v3852_v34 = vld [vmem:[#allocation8 + $0x388] ss:$16 sps:$4 sm:$0xff]  }
 0x1c1   :  { %v1550_v47 = vadd.f32 %v1549_v37, %v1509_v44  ;;  %v3860_v37 = vld [vmem:[#allocation8 + $0x34c] ss:$16 sps:$4 sm:$0xff]  }
 0x1c2   :  { %v1551_v52 = vpop.f32.mrf.mxu0  ;;  %v3876_v44 = vld [vmem:[#allocation10 + $0x18] sm:$0xff]  }
 0x1c3   :  { %2545 = vmatpush2.bf16.msra.mxu0 %v3804_v35  ;;  %v3855_v35 = vld [vmem:[#allocation8 + $0x368] ss:$16 sps:$4 sm:$0xff]  }
 0x1c4   :  { %v1552_v43 = vpop.f32.mrf.mxu0  ;;  %2546 = vmatprep.subr.bf16.mxu0 %v3812_v20  ;;  %v3858_v20 = vld [vmem:[#allocation8 + $0x348] ss:$16 sps:$4 sm:$0xff]  }
 0x1c5   :  { %v3861_v52 = vld [vmem:[#allocation8 + $0x328] ss:$16 sps:$4 sm:$0xff]  }
 0x1c6   :  { %v1629_v46 = vpop.f32.mrf.mxu0  ;;  %v3875_v43 = vld [vmem:[#allocation10 + $0x58] sm:$0xff]  }
 0x1c7   :  { %v1588_v45 = vpop.f32.mrf.mxu1  ;;  %2547 = vmatpush2.bf16.msra.mxu0 %v3810_v42  ;;  %v3864_v42 = vld [vmem:[#allocation8 + $0x308] ss:$16 sps:$4 sm:$0xff]  }
 0x1c8   :  { %v1589_v48 = vadd.f32 %v1588_v45, %v1548_v36  ;;  %v1631_v50 = vpop.f32.mrf.mxu0  ;;  %3326 = vmatprep.subr.bf16.mxu0 %v3867_v1  ;;  %v3877_v36 = vld [vmem:[#allocation10 + $0x50] sm:$0xff]  }
 0x1c9   :  { %v1590_v49 = vpop.f32.mrf.mxu1  ;;  %v3878_v45 = vld [vmem:[#allocation10 + $0x10] sm:$0xff]  }
 0x1ca   :  { %v1630_v51 = vadd.f32 %v1629_v46, %v1589_v48  ;;  %v1591_v53 = vadd.f32 %v1590_v49, %v1550_v47  ;;  %2549 = vmatmul.mubr.bf16.vlgmr.msra.gmra.mxu0 %v4139_v61  ;;  %v1633_v54 = vpop.f32.mrf.mxu0  ;;  %v3822_v61 = vld [vmem:[#allocation8 + $0x2c8] ss:$16 sps:$4 sm:$0xff]   ;;  %v3881_v48 = vld [vmem:[#allocation10 + $0x40] sm:$0xff]  }
 0x1cb   :  { %v1592_v8 = vpop.f32.mrf.mxu1  ;;  %3327 = vmatpush3.bf16.msra.mxu0 %v3868_v2  ;;  %v3879_v46 = vld [vmem:[#allocation10 + $0x48] sm:$0xff]   ;;  %v3882_v49 = vld [vmem:[#allocation10] sm:$0xff]  }
 0x1cc   :  { %v1632_v55 = vadd.f32 %v1631_v50, %v1591_v53  ;;  %v1638_v56 = vmax.f32 %v1630_v51, 0.0  ;;  %v1634_v58 = vpop.f32.mrf.mxu0  ;;  %3328 = vmatprep.subr.bf16.mxu0 %v3869_v3  ;;  %v3880_v47 = vld [vmem:[#allocation10 + $0x8] sm:$0xff]   ;;  %v3883_v50 = vld [vmem:[#allocation10 + $0xf8] sm:$0xff]   ;;  %v3885_v53 = vld [vmem:[#allocation10 + $0xf0] sm:$0xff]  }
 0x1cd   :  { %v1593_v57 = vpop.f32.mrf.mxu1  ;;  %v3884_v51 = vld [vmem:[#allocation10 + $0xb8] sm:$0xff]   ;;  %v3886_v8 = vld [vmem:[#allocation10 + $0xb0] sm:$0xff]   ;;  %v3887_v54 = vld [vmem:[#allocation10 + $0xe8] sm:$0xff]  }
 0x1ce   :  { %v1639_v59 = vmax.f32 %v1632_v55, 0.0  ;;  %v4155_v63 = vpack.c.bf16 %v1638_v56, %v1638_v56  ;;  %v3888_v55 = vld [vmem:[#allocation10 + $0xa8] sm:$0xff]   ;;  %v3889_v56 = vld [vmem:[#allocation10 + $0xe0] sm:$0xff]   ;;  %v3891_v58 = vld [vmem:[#allocation10 + $0xd8] sm:$0xff]  }
 0x1cf   :  { %3329 = vmatpush3.bf16.msra.mxu0 %v3870_v5  ;;  %v3890_v57 = vld [vmem:[#allocation10 + $0xa0] sm:$0xff]   ;;  %v3895_v3 = vld [vmem:[#allocation10 + $0xc8] sm:$0xff]  }
 0x1d0   :  { %v1643_v60 = vpack.c.bf16 %v1639_v59, %v1639_v59  ;;  %3330 = vmatprep.subr.bf16.mxu0 %v3871_v6  ;;  %v3892_v59 = vld [vmem:[#allocation10 + $0x98] sm:$0xff]   ;;  %v3898_v5 = vld [vmem:[#allocation10 + $0x80] sm:$0xff]  }
 0x1d1   :  { %v1772_v6 = vld [vmem:[%s4180_s4] sm:$0xf] }
 0x1d2   :  { %2507 = vmatprep.mubr.bf16.mxu1 %v1643_v60 }
 0x1d3   :  { %2508 = vmatmul.mubr.bf16.vlgmr.msra.gmra.mxu1 %v4155_v63  ;;  %3331 = vmatpush3.bf16.msra.mxu0 %v3872_v11  ;;  %v1777_v11 = vrot.slane %v1772_v6, %v306_v40  ;;  %v1785_v40 = vrot.slane %v1772_v6, %v314_v31 }
 0x1d4   :  { %2558 = vmatpush1.bf16.msra.mxu1 %v3819_v62  ;;  %2589 = vmatprep.mubr.bf16.mxu1 %v1643_v60  ;;  %v3893_v60 = vld [vmem:[#allocation10 + $0xd0] sm:$0xff]  }
 0x1d5   :  { %2559 = vmatprep.subr.bf16.mxu1 %v3824_v0  ;;  %3332 = vmatprep.subr.bf16.mxu0 %v3873_v12  ;;  %v3894_v62 = vld [vmem:[#allocation10 + $0x90] sm:$0xff]  }
 0x1d7   :  { %3333 = vmatpush3.bf16.msra.mxu0 %v3874_v15 }
 0x1d8   :  { %2560 = vmatpush1.bf16.msra.mxu1 %v3822_v61  ;;  %3334 = vmatprep.subr.bf16.mxu0 %v3875_v43  ;;  %v3896_v61 = vld [vmem:[#allocation10 + $0x88] sm:$0xff]  }
 0x1d9   :  { %2561 = vmatprep.subr.bf16.mxu1 %v3827_v4  ;;  %v3897_v4 = vld [vmem:[#allocation10 + $0xc0] sm:$0xff]  }
 0x1db   :  { %3335 = vmatpush3.bf16.msra.mxu0 %v3876_v44 }
 0x1dc   :  { %2562 = vmatpush1.bf16.msra.mxu1 %v3825_v7  ;;  %3336 = vmatprep.subr.bf16.mxu0 %v3877_v36 }
 0x1dd   :  { %2563 = vmatprep.subr.bf16.mxu1 %v3830_v10 }
 0x1df   :  { %3337 = vmatpush3.bf16.msra.mxu0 %v3878_v45 }
 0x1e0   :  { %2564 = vmatpush1.bf16.msra.mxu1 %v3828_v13  ;;  %3338 = vmatprep.subr.bf16.mxu0 %v3879_v46  ;;  %v1781_v13 = vrot.slane %v1772_v6, %v310_v41  ;;  %v1789_v41 = vrot.slane %v1772_v6, %v318_v9  ;;  %v3293_v9 = vld [vmem:[%s4182_s6] ss:$0 sm:$0xff] }
 0x1e1   :  { %2565 = vmatprep.subr.bf16.mxu1 %v3833_v14 }
 0x1e3   :  { %3339 = vmatpush3.bf16.msra.mxu0 %v3880_v47 }
 0x1e4   :  { %2566 = vmatpush1.bf16.msra.mxu1 %v3831_v17  ;;  %3340 = vmatprep.subr.bf16.mxu0 %v3881_v48 }
 0x1e5   :  { %2567 = vmatprep.subr.bf16.mxu1 %v3836_v18 }
 0x1e7   :  { %3341 = vmatpush3.bf16.msra.mxu0 %v3882_v49 }
 0x1e8   :  { %2568 = vmatpush1.bf16.msra.mxu1 %v3834_v21 }
 0x1e9   :  { %2569 = vmatprep.subr.bf16.mxu1 %v3839_v22 }
 0x1ec   :  { %2570 = vmatpush1.bf16.msra.mxu1 %v3837_v23 }
 0x1ed   :  { %2571 = vmatprep.subr.bf16.mxu1 %v3842_v24 }
 0x1f0   :  { %2572 = vmatpush1.bf16.msra.mxu1 %v3840_v25 }
 0x1f1   :  { %2573 = vmatprep.subr.bf16.mxu1 %v3845_v26 }
 0x1f4   :  { %2574 = vmatpush2.bf16.msra.mxu1 %v3843_v27 }
 0x1f5   :  { %2575 = vmatprep.subr.bf16.mxu1 %v3848_v28 }
 0x1f8   :  { %2576 = vmatpush2.bf16.msra.mxu1 %v3846_v29 }
 0x1f9   :  { %2577 = vmatprep.subr.bf16.mxu1 %v3851_v30 }
 0x1fc   :  { %2578 = vmatpush2.bf16.msra.mxu1 %v3849_v32 }
 0x1fd   :  { %2579 = vmatprep.subr.bf16.mxu1 %v3854_v33 }
 0x200   :  { %2580 = vmatpush2.bf16.msra.mxu1 %v3852_v34 }
 0x201   :  { %2581 = vmatprep.subr.bf16.mxu1 %v3857_v16 }
 0x204   :  { %2582 = vmatpush2.bf16.msra.mxu1 %v3855_v35 }
 0x205   :  { %2583 = vmatprep.subr.bf16.mxu1 %v3860_v37 }
 0x208   :  { %2584 = vmatpush2.bf16.msra.mxu1 %v3858_v20 }
 0x209   :  { %2585 = vmatprep.subr.bf16.mxu1 %v3863_v38 }
 0x20c   :  { %2586 = vmatpush2.bf16.msra.mxu1 %v3861_v52 }
 0x20d   :  { %2587 = vmatprep.subr.bf16.mxu1 %v3866_v19 }
 0x210   :  { %2588 = vmatpush2.bf16.msra.mxu1 %v3864_v42 }
 0x211   :  { %3348 = vmatprep.subr.bf16.mxu1 %v3883_v50 }
 0x213   :  { %2590 = vmatmul.mubr.bf16.vlgmr.msra.gmra.mxu1 %v4155_v63 }
 0x214   :  { %3349 = vmatpush3.bf16.msra.mxu1 %v3884_v51 }
 0x215   :  { %3350 = vmatprep.subr.bf16.mxu1 %v3885_v53 }
 0x218   :  { %3351 = vmatpush3.bf16.msra.mxu1 %v3886_v8 }
 0x219   :  { %3352 = vmatprep.subr.bf16.mxu1 %v3887_v54 }
 0x21c   :  { %3353 = vmatpush3.bf16.msra.mxu1 %v3888_v55 }
 0x21d   :  { %3354 = vmatprep.subr.bf16.mxu1 %v3889_v56 }
 0x220   :  { %3355 = vmatpush3.bf16.msra.mxu1 %v3890_v57 }
 0x221   :  { %3356 = vmatprep.subr.bf16.mxu1 %v3891_v58 }
 0x224   :  { %3357 = vmatpush3.bf16.msra.mxu1 %v3892_v59 }
 0x225   :  { %3358 = vmatprep.subr.bf16.mxu1 %v3893_v60 }
 0x228   :  { %3359 = vmatpush3.bf16.msra.mxu1 %v3894_v62 }
 0x229   :  { %3360 = vmatprep.subr.bf16.mxu1 %v3895_v3 }
 0x22c   :  { %3361 = vmatpush3.bf16.msra.mxu1 %v3896_v61 }
 0x22d   :  { %3362 = vmatprep.subr.bf16.mxu1 %v3897_v4 }
 0x230   :  { %3363 = vmatpush3.bf16.msra.mxu1 %v3898_v5 }
 0x24a   :  { %v2468_v63 = vpop.f32.mrf.mxu0 }
 0x24b   :  { %v2469_v15 = vadd.f32 %v2468_v63, %v1777_v11 }
 0x24c   :  { %v2470_v0 = vpop.f32.mrf.mxu0 }
 0x24d   :  { %v2471_v18 = vadd.f32 %v2470_v0, %v1781_v13 }
 0x24e   :  { %v2472_v1 = vpop.f32.mrf.mxu0 }
 0x250   :  { %v2473_v2 = vpop.f32.mrf.mxu0 }
 0x28a   :  { %v2550_v7 = vpop.f32.mrf.mxu0 }
 0x28b   :  { %v2551_v30 = vadd.f32 %v2550_v7, %v1785_v40 }
 0x28c   :  { %v2552_v10 = vpop.f32.mrf.mxu0 }
 0x28d   :  { %v2553_v33 = vadd.f32 %v2552_v10, %v1789_v41 }
 0x28e   :  { %v2554_v12 = vpop.f32.mrf.mxu0 }
 0x290   :  { %v2555_v14 = vpop.f32.mrf.mxu0 }
 0x293   :  { %v2509_v17 = vpop.f32.mrf.mxu1 }
 0x294   :  { %v2510_v21 = vadd.f32 %v2509_v17, %v2469_v15 }
 0x295   :  { %v2511_v22 = vpop.f32.mrf.mxu1 }
 0x296   :  { %v2512_v23 = vadd.f32 %v2511_v22, %v2471_v18  ;;  %v2598_v24 = vmax.f32 %v2510_v21, 0.0 }
 0x297   :  { %v2513_v25 = vpop.f32.mrf.mxu1 }
 0x298   :  { %v2599_v26 = vmax.f32 %v2512_v23, 0.0  ;;  %v2602_v29 = vpack.c.bf16 %v2598_v24, %v2598_v24 }
 0x299   :  { %v2514_v27 = vpop.f32.mrf.mxu1 }
 0x29a   :  { %v2603_v28 = vpack.c.bf16 %v2599_v26, %v2599_v26 }
 0x29c   :  { %2901 = vmatprep.mubr.bf16.mxu0 %v2603_v28 }
 0x29d   :  { %2902 = vmatmul.mubr.bf16.vlgmr.msra.gmra.mxu0 %v2602_v29 }
 0x2d3   :  { %v2591_v32 = vpop.f32.mrf.mxu1 }
 0x2d4   :  { %v2592_v34 = vadd.f32 %v2591_v32, %v2551_v30 }
 0x2d5   :  { %v2593_v16 = vpop.f32.mrf.mxu1 }
 0x2d6   :  { %v2594_v35 = vadd.f32 %v2593_v16, %v2553_v33  ;;  %v2600_v37 = vmax.f32 %v2592_v34, 0.0 }
 0x2d7   :  { %v2595_v20 = vpop.f32.mrf.mxu1 }
 0x2d8   :  { %v2601_v38 = vmax.f32 %v2594_v35, 0.0  ;;  %v2604_v42 = vpack.c.bf16 %v2600_v37, %v2600_v37 }
 0x2d9   :  { %v2596_v52 = vpop.f32.mrf.mxu1 }
 0x2da   :  { %v2605_v19 = vpack.c.bf16 %v2601_v38, %v2601_v38 }
 0x2dc   :  { %2941 = vmatprep.mubr.bf16.mxu1 %v2605_v19 }
 0x2dd   :  { %2942 = vmatmul.mubr.bf16.vlgmr.msra.gmra.mxu1 %v2604_v42 }
 0x35d   :  { %v3342_v43 = vpop.f32.mrf.mxu0 }
 0x35f   :  { %v3343_v44 = vpop.f32.mrf.mxu0 }
 0x360   :  { %v3344_v39 = vadd.f32 %v3343_v44, %v3342_v43 }
 0x361   :  { %v3345_v31 = vpop.f32.mrf.mxu0 }
 0x362   :  { %v2904_v47 = vadd.f32 %v3344_v39, %v3293_v9 }
 0x363   :  { %v3346_v36 = vpop.f32.mrf.mxu0 }
 0x39d   :  { %v3364_v45 = vpop.f32.mrf.mxu1 }
 0x39f   :  { %v3365_v46 = vpop.f32.mrf.mxu1 }
 0x3a0   :  { %v3366_v48 = vadd.f32 %v3365_v46, %v3364_v45 }
 0x3a1   :  { %v3367_v49 = vpop.f32.mrf.mxu1 }
 0x3a2   :  { %v2944_v50 = vadd.f32 %v3366_v48, %v2904_v47 }
 0x3a3   :  { %v3368_v51 = vpop.f32.mrf.mxu1 }
 0x3a4   :  { %2949 = vst [vmem:[#allocation11] sm:$0xff] %v2944_v50 }
 0x3a5   :  { %4010 = shalt.err (!%p4007_p1)
}
 0x3a6   :  { %2959 = dma.vmem_to_hbm [thread:$0]  %s2957_s29, 128, %s4183_s7, [#allocation4]  }
 0x3a7   :  { %4025 = dma.done.wait [#allocation4], 128  }
 0x3a8   :  { %4026 = vsyncadd [#allocation4], 4294967168 }
 0x3a9   :  { %2963 = vsyncpa [#allocation3], 1 }
 0x3aa   :  { %2964 = vsyncpa [#allocation6], 1 }
 0x3ab   :  { %2965 = vsyncpa [#allocation9], 1 }
 0x3ac   :  { %2966 = vsyncpa [#allocation4], 1 }

</bundles_post_ra>
